<compile_context>
chip_gen: v7x
topology: tpu7x:2x2x1
jax: 0.10.0
libtpu: 0.0.40
codegen_flags: <defaults>
</compile_context>

<pallas_src>
import functools

import jax
import jax.numpy as jnp
from jax import lax
from jax.experimental import pallas as pl
from jax.experimental.pallas import tpu as pltpu

_H = 768  # hidden size fixed by the module (nn.Linear(768, vocab_size))


def _ce_kernel(x_ref, wt_ref, b_ref, lbl_ref, loss_ref, m_scr, l_scr, t_scr):
    j = pl.program_id(1)                 # vocab tile index (reduction axis)
    nj = pl.num_programs(1)
    tn = x_ref.shape[0]
    tv = wt_ref.shape[1]

    @pl.when(j == 0)
    def _():
        m_scr[...] = jnp.full_like(m_scr, -1e30)
        l_scr[...] = jnp.zeros_like(l_scr)
        t_scr[...] = jnp.zeros_like(t_scr)

    # Canonical MXU form: x (tn, H) . Wt (H, tv) -> (tn, tv), f32 accumulate.
    logits = jnp.dot(
        x_ref[...], wt_ref[...], preferred_element_type=jnp.float32
    ) + b_ref[...]
    # No tail mask needed: padded vocab columns carry bias = -1e30.

    # Online logsumexp over the vocab axis.
    m_old = m_scr[...]
    m_new = jnp.maximum(m_old, logits.max(axis=-1, keepdims=True))
    l_scr[...] = jnp.exp(m_old - m_new) * l_scr[...] + jnp.sum(
        jnp.exp(logits - m_new), axis=-1, keepdims=True
    )
    m_scr[...] = m_new

    # Gather the logit at the label position via a tile-local masked reduction.
    col_local = lax.broadcasted_iota(jnp.int32, (tn, tv), 1)
    lbl_local = lbl_ref[...] - j * tv                 # (tn, 1)
    t_scr[...] += jnp.sum(
        jnp.where(col_local == lbl_local, logits, 0.0), axis=-1, keepdims=True
    )

    @pl.when(j == nj - 1)
    def _():
        # Per-row negative log-likelihood.
        loss_ref[...] = (m_scr[...] + jnp.log(l_scr[...])) - t_scr[...]


def _gen_defaults():
    """Per-generation row/vocab tile targets and a VMEM-limit cap."""
    try:
        kind = jax.devices()[0].device_kind.lower()
    except Exception:  # pragma: no cover - defensive only
        kind = ""
    if "v5" in kind:
        # ~240 flop/byte crossover; 128 MiB VMEM but 16 MiB scoped default.
        return 256, 2048, 100 * 1024 * 1024, False
    if "v6" in kind:
        # ~650 flop/byte crossover; 128 MiB VMEM -> big tiles are fine.
        return 768, 4096, 100 * 1024 * 1024, False
    # v7x (and unknown): 64 MiB VMEM per TC, 2 TCs -> smaller footprint,
    # keep >= 2 row tiles so both TensorCores get work.
    return 512, 2048, 56 * 1024 * 1024, True


@functools.partial(jax.jit, static_argnames=("tn", "tv"))
def linear_and_softmax_loss(x, label, weight, bias, *, tn=None, tv=None):
    """x: (B, S, H) f32, label: (B, S) int, weight: (V, H) f32, bias: (V,) f32."""
    B, S, H = x.shape
    V = weight.shape[0]
    N = B * S

    tn_want, tv_want, vmem_cap, two_cores = _gen_defaults()

    Nr = ((N + 7) // 8) * 8
    if tn is None:
        tn = min(tn_want, Nr)
        # Megacore: keep >= 2 row tiles when the row count allows it.
        if two_cores and Nr > 256 and pl.cdiv(Nr, tn) < 2:
            tn = max(256, ((pl.cdiv(Nr, 2) + 127) // 128) * 128)
    if tv is None:
        tv = min(tv_want, ((V + 127) // 128) * 128)
    tv = ((tv + 127) // 128) * 128          # lane-aligned vocab tile

    Np = pl.cdiv(N, tn) * tn
    Vp = pl.cdiv(V, tv) * tv
    nv = Vp // tv

    # --- input prep (one fused pass each, outside the kernel) ---------------
    x2 = x.reshape(N, H).astype(jnp.bfloat16)
    lbl = label.reshape(N).astype(jnp.int32)
    if Np != N:
        x2 = jnp.pad(x2, ((0, Np - N), (0, 0)))
        lbl = jnp.pad(lbl, (0, Np - N))
    lbl2 = lbl.reshape(Np, 1)

    # Weight: single prep combining transpose -> (H, V), bf16 cast, and vocab
    # padding (zero columns).  Bias padded with -1e30 so padded logits never
    # win the max / contribute to sumexp; no in-kernel tail mask needed.
    wt = weight.T.astype(jnp.bfloat16)
    b2 = bias.astype(jnp.float32).reshape(1, V)
    if Vp != V:
        wt = jnp.pad(wt, ((0, 0), (0, Vp - V)))
        b2 = jnp.pad(b2, ((0, 0), (0, Vp - V)), constant_values=-1e30)

    # --- VMEM budget derived from the actual tile footprint ------------------
    nbuf_w = 3 if nv >= 3 else 2
    vmem_est = (
        2 * tn * H * 2            # x double-buffer (bf16)
        + nbuf_w * H * tv * 2     # W buffers (bf16)
        + 2 * tv * 4              # bias
        + 4 * tn * 4              # labels + output buffers
        + 3 * tn * 4              # m/l/t accumulators
        + 5 * tn * tv * 4         # f32 logits + elementwise temporaries
    )
    vmem_limit = int(min(max(vmem_est * 5 // 4, 32 * 1024 * 1024), vmem_cap))

    # Weight is the dominant HBM stream: triple-buffer it when the vocab axis
    # is long enough for the extra buffer to matter.
    if nv >= 3:
        w_spec = pl.BlockSpec((H, tv), lambda i, j: (0, j),
                              pipeline_mode=pl.Buffered(3))
    else:
        w_spec = pl.BlockSpec((H, tv), lambda i, j: (0, j))

    per_row_nll = pl.pallas_call(
        _ce_kernel,
        out_shape=jax.ShapeDtypeStruct((Np, 1), jnp.float32),
        grid_spec=pltpu.PrefetchScalarGridSpec(
            num_scalar_prefetch=0,
            grid=(Np // tn, nv),                      # (rows, vocab) — vocab last
            in_specs=[
                pl.BlockSpec((tn, H), lambda i, j: (i, 0)),   # x row tile (bf16)
                w_spec,                                       # W^T tile (bf16)
                pl.BlockSpec((1, tv), lambda i, j: (0, j)),   # bias tile (f32)
                pl.BlockSpec((tn, 1), lambda i, j: (i, 0)),   # labels row tile
            ],
            out_specs=pl.BlockSpec((tn, 1), lambda i, j: (i, 0)),
            scratch_shapes=[
                pltpu.VMEM((tn, 1), jnp.float32),  # running max m
                pltpu.VMEM((tn, 1), jnp.float32),  # running sumexp l
                pltpu.VMEM((tn, 1), jnp.float32),  # gathered label logit
            ],
        ),
        compiler_params=pltpu.CompilerParams(
            dimension_semantics=("parallel", "arbitrary"),
            vmem_limit_bytes=vmem_limit,
        ),
    )(x2, wt, b2, lbl2)

    # CrossEntropyLoss defaults: reduction='mean', ignore_index=-100.
    per_row = per_row_nll[:N, 0]
    valid = label.reshape(N) != -100
    cnt = jnp.maximum(jnp.sum(valid), 1)
    return jnp.sum(jnp.where(valid, per_row, 0.0)) / cnt.astype(jnp.float32)


def _reference_loss(x, label, weight, bias):
    """Reference matched to the kernel's bf16-input / f32-accumulate matmul."""
    H = x.shape[-1]
    xf = x.reshape(-1, H).astype(jnp.bfloat16).astype(jnp.float32)
    wf = weight.astype(jnp.bfloat16).astype(jnp.float32)
    logits = jnp.dot(xf, wf.T, precision=lax.Precision.HIGHEST) + bias
    lse = jax.scipy.special.logsumexp(logits, axis=-1)
    lbl = label.reshape(-1)
    picked = jnp.take_along_axis(logits, lbl[:, None], axis=-1)[:, 0]
    valid = lbl != -100
    nll = jnp.where(valid, lse - picked, 0.0)
    return jnp.sum(nll) / jnp.maximum(jnp.sum(valid), 1)


if __name__ == "__main__":
    # Small shapes consistent with the module: hidden=768 (fixed by nn.Linear),
    # small batch/seq, and a small vocab_size (constructor parameter).
    B, S, H, V = 2, 8, 768, 1024

    key = jax.random.PRNGKey(0)
    kx, kl, kw, kb = jax.random.split(key, 4)

    x = jax.random.normal(kx, (B, S, H), dtype=jnp.float32)
    label = jax.random.randint(kl, (B, S), 0, V, dtype=jnp.int32)

    # Deterministic nn.Linear-style init: U(-1/sqrt(H), 1/sqrt(H))
    bound = 1.0 / (H ** 0.5)
    weight = jax.random.uniform(kw, (V, H), jnp.float32, -bound, bound)
    bias = jax.random.uniform(kb, (V,), jnp.float32, -bound, bound)

    ref = _reference_loss(x, label, weight, bias)

    # Default tiling: generation-derived tn/tv (single vocab tile at V=1024).
    loss = linear_and_softmax_loss(x, label, weight, bias)
    loss = jax.block_until_ready(loss)
    assert jnp.allclose(loss, ref, rtol=1e-3, atol=1e-3), (loss, ref)

    # Also exercise the multi-tile reduction path (tiled N + tiled vocab,
    # which takes the triple-buffered weight-stream branch: nv = 4).
    loss2 = linear_and_softmax_loss(x, label, weight, bias, tn=8, tv=256)
    loss2 = jax.block_until_ready(loss2)
    assert jnp.allclose(loss2, ref, rtol=1e-3, atol=1e-3), (loss2, ref)

    print("KERNEL_OK")
</pallas_src>

<mosaic_0001>
module attributes {stable_mosaic.version = 11 : i64} {
  func.func @_ce_kernel(%arg0: i32, %arg1: i32, %arg2: memref<16x768xbf16, #tpu.memory_space<vmem>>, %arg3: memref<768x1024xbf16, #tpu.memory_space<vmem>>, %arg4: memref<1x1024xf32, #tpu.memory_space<vmem>>, %arg5: memref<16x1xi32, #tpu.memory_space<vmem>>, %arg6: memref<16x1xf32, #tpu.memory_space<vmem>>, %arg7: memref<16x1xf32, #tpu.memory_space<vmem>>, %arg8: memref<16x1xf32, #tpu.memory_space<vmem>>, %arg9: memref<16x1xf32, #tpu.memory_space<vmem>>) attributes {dimension_semantics = [#tpu.dimension_semantics<parallel>, #tpu.dimension_semantics<arbitrary>], iteration_bounds = array<i64: 1, 1>, scalar_prefetch = 0 : i64, scratch_operands = 3 : i64, tpu.core_type = #tpu.core_type<tc>, window_params = [{transform_indices = @transform_0, window_bounds = array<i64: 16, 768>}, {transform_indices = @transform_1, window_bounds = array<i64: 768, 1024>}, {transform_indices = @transform_2, window_bounds = array<i64: 1, 1024>}, {transform_indices = @transform_3, window_bounds = array<i64: 16, 1>}, {transform_indices = @transform_4, window_bounds = array<i64: 16, 1>}]} {
    %c0_i32 = arith.constant 0 : i32
    %0 = arith.cmpi eq, %arg1, %c0_i32 : i32
    %1 = arith.extui %0 : i1 to i32
    %c0_i32_0 = arith.constant 0 : i32
    %2 = arith.cmpi ne, %1, %c0_i32_0 : i32
    scf.if %2 {
      %cst_26 = arith.constant -1.000000e+30 : f32
      %42 = vector.broadcast %cst_26 : f32 to vector<16x1xf32>
      %c0_27 = arith.constant 0 : index
      %c0_28 = arith.constant 0 : index
      %43 = vector.load %arg7[%c0_27, %c0_28] : memref<16x1xf32, #tpu.memory_space<vmem>>, vector<16x1xf32>
      tpu.vector_store %arg7[%c0_27, %c0_28], %42 {strides = array<i32>} : memref<16x1xf32, #tpu.memory_space<vmem>>, vector<16x1xf32>,
      %cst_29 = arith.constant 0.000000e+00 : f32
      %44 = vector.broadcast %cst_29 : f32 to vector<16x1xf32>
      %c0_30 = arith.constant 0 : index
      %c0_31 = arith.constant 0 : index
      %45 = vector.load %arg8[%c0_30, %c0_31] : memref<16x1xf32, #tpu.memory_space<vmem>>, vector<16x1xf32>
      tpu.vector_store %arg8[%c0_30, %c0_31], %44 {strides = array<i32>} : memref<16x1xf32, #tpu.memory_space<vmem>>, vector<16x1xf32>,
      %cst_32 = arith.constant 0.000000e+00 : f32
      %46 = vector.broadcast %cst_32 : f32 to vector<16x1xf32>
      %c0_33 = arith.constant 0 : index
      %c0_34 = arith.constant 0 : index
      %47 = vector.load %arg9[%c0_33, %c0_34] : memref<16x1xf32, #tpu.memory_space<vmem>>, vector<16x1xf32>
      tpu.vector_store %arg9[%c0_33, %c0_34], %46 {strides = array<i32>} : memref<16x1xf32, #tpu.memory_space<vmem>>, vector<16x1xf32>,
    } else {
    }
    %c0 = arith.constant 0 : index
    %c0_1 = arith.constant 0 : index
    %3 = vector.load %arg2[%c0, %c0_1] : memref<16x768xbf16, #tpu.memory_space<vmem>>, vector<16x768xbf16>
    %c0_2 = arith.constant 0 : index
    %c0_3 = arith.constant 0 : index
    %4 = vector.load %arg3[%c0_2, %c0_3] : memref<768x1024xbf16, #tpu.memory_space<vmem>>, vector<768x1024xbf16>
    %cst = arith.constant dense<0.000000e+00> : vector<16x1024xf32>
    %5 = tpu.matmul %3, %4, %cst {dimension_numbers = #tpu.dot_dimension_numbers<[1], [0], [0], [1], [0, 0, 1, 1], [], []>} : vector<16x768xbf16>, vector<768x1024xbf16>, vector<16x1024xf32> -> vector<16x1024xf32>
    %c0_4 = arith.constant 0 : index
    %c0_5 = arith.constant 0 : index
    %6 = vector.load %arg4[%c0_4, %c0_5] : memref<1x1024xf32, #tpu.memory_space<vmem>>, vector<1x1024xf32>
    %7 = vector.broadcast %6 : vector<1x1024xf32> to vector<16x1024xf32>
    %8 = arith.addf %5, %7 : vector<16x1024xf32>
    %c0_6 = arith.constant 0 : index
    %c0_7 = arith.constant 0 : index
    %9 = vector.load %arg7[%c0_6, %c0_7] : memref<16x1xf32, #tpu.memory_space<vmem>>, vector<16x1xf32>
    %cst_8 = arith.constant dense<0xFF800000> : vector<16xf32>
    %10 = vector.multi_reduction <maximumf>, %8, %cst_8 [1] : vector<16x1024xf32> to vector<16xf32>
    %11 = vector.shape_cast %10 : vector<16xf32> to vector<16x1xf32>
    %12 = arith.maximumf %9, %11 : vector<16x1xf32>
    %13 = arith.subf %9, %12 : vector<16x1xf32>
    %14 = math.exp %13 : vector<16x1xf32>
    %c0_9 = arith.constant 0 : index
    %c0_10 = arith.constant 0 : index
    %15 = vector.load %arg8[%c0_9, %c0_10] : memref<16x1xf32, #tpu.memory_space<vmem>>, vector<16x1xf32>
    %16 = arith.mulf %14, %15 : vector<16x1xf32>
    %17 = vector.broadcast %12 : vector<16x1xf32> to vector<16x1024xf32>
    %18 = arith.subf %8, %17 : vector<16x1024xf32>
    %19 = math.exp %18 : vector<16x1024xf32>
    %cst_11 = arith.constant dense<0.000000e+00> : vector<16xf32>
    %20 = vector.multi_reduction <add>, %19, %cst_11 [1] : vector<16x1024xf32> to vector<16xf32>
    %21 = vector.shape_cast %20 : vector<16xf32> to vector<16x1xf32>
    %22 = arith.addf %16, %21 : vector<16x1xf32>
    %c0_12 = arith.constant 0 : index
    %c0_13 = arith.constant 0 : index
    %23 = vector.load %arg8[%c0_12, %c0_13] : memref<16x1xf32, #tpu.memory_space<vmem>>, vector<16x1xf32>
    tpu.vector_store %arg8[%c0_12, %c0_13], %22 {strides = array<i32>} : memref<16x1xf32, #tpu.memory_space<vmem>>, vector<16x1xf32>,
    %c0_14 = arith.constant 0 : index
    %c0_15 = arith.constant 0 : index
    %24 = vector.load %arg7[%c0_14, %c0_15] : memref<16x1xf32, #tpu.memory_space<vmem>>, vector<16x1xf32>
    tpu.vector_store %arg7[%c0_14, %c0_15], %12 {strides = array<i32>} : memref<16x1xf32, #tpu.memory_space<vmem>>, vector<16x1xf32>,
    %25 = tpu.iota {dimensions = array<i32: 1>} : vector<16x1024xi32>
    %c0_16 = arith.constant 0 : index
    %c0_17 = arith.constant 0 : index
    %26 = vector.load %arg5[%c0_16, %c0_17] : memref<16x1xi32, #tpu.memory_space<vmem>>, vector<16x1xi32>
    %c1024_i32 = arith.constant 1024 : i32
    %27 = arith.muli %arg1, %c1024_i32 : i32
    %28 = vector.broadcast %27 : i32 to vector<16x1xi32>
    %29 = arith.subi %26, %28 : vector<16x1xi32>
    %c0_18 = arith.constant 0 : index
    %c0_19 = arith.constant 0 : index
    %30 = vector.load %arg9[%c0_18, %c0_19] : memref<16x1xf32, #tpu.memory_space<vmem>>, vector<16x1xf32>
    %31 = vector.broadcast %29 : vector<16x1xi32> to vector<16x1024xi32>
    %32 = arith.cmpi eq, %25, %31 : vector<16x1024xi32>
    %cst_20 = arith.constant 0.000000e+00 : f32
    %33 = vector.broadcast %cst_20 : f32 to vector<16x1024xf32>
    %34 = arith.select %32, %8, %33 : vector<16x1024xi1>, vector<16x1024xf32>
    %cst_21 = arith.constant dense<0.000000e+00> : vector<16xf32>
    %35 = vector.multi_reduction <add>, %34, %cst_21 [1] : vector<16x1024xf32> to vector<16xf32>
    %36 = vector.shape_cast %35 : vector<16xf32> to vector<16x1xf32>
    %37 = arith.addf %30, %36 : vector<16x1xf32>
    %c0_22 = arith.constant 0 : index
    %c0_23 = arith.constant 0 : index
    %38 = vector.load %arg9[%c0_22, %c0_23] : memref<16x1xf32, #tpu.memory_space<vmem>>, vector<16x1xf32>
    tpu.vector_store %arg9[%c0_22, %c0_23], %37 {strides = array<i32>} : memref<16x1xf32, #tpu.memory_space<vmem>>, vector<16x1xf32>,
    %c0_i32_24 = arith.constant 0 : i32
    %39 = arith.cmpi eq, %arg1, %c0_i32_24 : i32
    %40 = arith.extui %39 : i1 to i32
    %c0_i32_25 = arith.constant 0 : i32
    %41 = arith.cmpi ne, %40, %c0_i32_25 : i32
    scf.if %41 {
      %c0_26 = arith.constant 0 : index
      %c0_27 = arith.constant 0 : index
      %42 = vector.load %arg7[%c0_26, %c0_27] : memref<16x1xf32, #tpu.memory_space<vmem>>, vector<16x1xf32>
      %c0_28 = arith.constant 0 : index
      %c0_29 = arith.constant 0 : index
      %43 = vector.load %arg8[%c0_28, %c0_29] : memref<16x1xf32, #tpu.memory_space<vmem>>, vector<16x1xf32>
      %44 = math.log %43 : vector<16x1xf32>
      %45 = arith.addf %42, %44 : vector<16x1xf32>
      %c0_30 = arith.constant 0 : index
      %c0_31 = arith.constant 0 : index
      %46 = vector.load %arg9[%c0_30, %c0_31] : memref<16x1xf32, #tpu.memory_space<vmem>>, vector<16x1xf32>
      %47 = arith.subf %45, %46 : vector<16x1xf32>
      %c0_32 = arith.constant 0 : index
      %c0_33 = arith.constant 0 : index
      %48 = vector.load %arg6[%c0_32, %c0_33] : memref<16x1xf32, #tpu.memory_space<vmem>>, vector<16x1xf32>
      tpu.vector_store %arg6[%c0_32, %c0_33], %47 {strides = array<i32>} : memref<16x1xf32, #tpu.memory_space<vmem>>, vector<16x1xf32>,
    } else {
    }
    return
  }
  func.func @transform_0(%arg0: i32, %arg1: i32) -> (i32, i32) {
    %c0_i32 = arith.constant 0 : i32
    %c0_i32_0 = arith.constant 0 : i32
    return %arg0, %c0_i32 : i32, i32
  }
  func.func @transform_1(%arg0: i32, %arg1: i32) -> (i32, i32) {
    %c0_i32 = arith.constant 0 : i32
    %c0_i32_0 = arith.constant 0 : i32
    return %c0_i32, %arg1 : i32, i32
  }
  func.func @transform_2(%arg0: i32, %arg1: i32) -> (i32, i32) {
    %c0_i32 = arith.constant 0 : i32
    %c0_i32_0 = arith.constant 0 : i32
    return %c0_i32, %arg1 : i32, i32
  }
  func.func @transform_3(%arg0: i32, %arg1: i32) -> (i32, i32) {
    %c0_i32 = arith.constant 0 : i32
    %c0_i32_0 = arith.constant 0 : i32
    return %arg0, %c0_i32 : i32, i32
  }
  func.func @transform_4(%arg0: i32, %arg1: i32) -> (i32, i32) {
    %c0_i32 = arith.constant 0 : i32
    %c0_i32_0 = arith.constant 0 : i32
    return %arg0, %c0_i32 : i32, i32
  }
}

</mosaic_0001>

<bundles_post_ra>
// kernel: linear_and_softmax_loss.1
= control target key start
LH: loop header
LB: loop body
LE: loop exit
PB: predicated region body
PF: predicated region fallthrough
CT: control target
= control target key end

     0   :  { %vm21_vm0 = vcmask 7168   ;;  %s5039_s1 = inlined_call_operand.vmem [shape: bf16[768,1024], index: 1, kind: input, shape index: {}]   ;;  %s5040_s0 = inlined_call_operand.vmem [shape: bf16[16,768], index: 0, kind: input, shape index: {}]   ;;  %s5041_s2 = inlined_call_operand.vmem [shape: f32[1,1024], index: 2, kind: input, shape index: {}]   ;;  %s5042_s3 = inlined_call_operand.vmem [shape: s32[16,1], index: 3, kind: input, shape index: {}]   ;;  %s5043_s4 = inlined_call_operand.vmem [shape: f32[16,1], index: 4, kind: output, shape index: {}]  }
   0x1   :  { %v34_v0 = vld [vmem:[%s5039_s1] sm:$0xff]  ;;  %v35_v2 = vld [vmem:[%s5039_s1 + $0x8] sm:$0xff] }
   0x2   :  { %v38_v1 = vld [vmem:[%s5039_s1 + $0x20] sm:$0xff]  ;;  %v39_v4 = vld [vmem:[%s5039_s1 + $0x28] sm:$0xff] }
   0x3   :  { %v3148_v3 = vcombine.high %v34_v0, %v38_v1  ;;  %v3147_v5 = vcombine.low %v34_v0, %v38_v1  ;;  %v42_v6 = vld [vmem:[%s5039_s1 + $0x40] sm:$0xff]  ;;  %v3150_v8 = vcombine.high %v35_v2, %v39_v4  ;;  %v3149_v9 = vcombine.low %v35_v2, %v39_v4  ;;  %v43_v11 = vld [vmem:[%s5039_s1 + $0x48] sm:$0xff] }
   0x4   :  { %v46_v7 = vld [vmem:[%s5039_s1 + $0x60] sm:$0xff]  ;;  %v47_v12 = vld [vmem:[%s5039_s1 + $0x68] sm:$0xff] }
   0x5   :  { %v3156_v10 = vcombine.high %v42_v6, %v46_v7  ;;  %v50_v13 = vld [vmem:[%s5039_s1 + $0x80] sm:$0xff]  ;;  %2410 = vmatprep.subr.bf16.mxu0 %v3148_v3  ;;  %v3158_v14 = vcombine.high %v43_v11, %v47_v12  ;;  %v51_v16 = vld [vmem:[%s5039_s1 + $0x88] sm:$0xff]  ;;  %2539 = vmatprep.subr.bf16.mxu1 %v3150_v8  ;;  %v3155_v18 = vcombine.low %v42_v6, %v46_v7 }
   0x6   :  { %v54_v15 = vld [vmem:[%s5039_s1 + $0xa0] sm:$0xff]  ;;  %v55_v17 = vld [vmem:[%s5039_s1 + $0xa8] sm:$0xff]  ;;  %2411 = vmatpush1.bf16.msra.mxu0 %v3147_v5  ;;  %2540 = vmatpush1.bf16.msra.mxu1 %v3149_v9  ;;  %v3157_v19 = vcombine.low %v43_v11, %v47_v12 }
   0x7   :  { %2412 = vmatprep.subr.bf16.mxu0 %v3156_v10  ;;  %v3164_v20 = vcombine.high %v50_v13, %v54_v15  ;;  %2541 = vmatprep.subr.bf16.mxu1 %v3158_v14  ;;  %v3166_v21 = vcombine.high %v51_v16, %v55_v17  ;;  %v58_v22 = vld [vmem:[%s5039_s1 + $0xc0] sm:$0xff]  ;;  %v59_v24 = vld [vmem:[%s5039_s1 + $0xc8] sm:$0xff]  ;;  %v3163_v26 = vcombine.low %v50_v13, %v54_v15 }
   0x8   :  { %v62_v23 = vld [vmem:[%s5039_s1 + $0xe0] sm:$0xff]  ;;  %v63_v25 = vld [vmem:[%s5039_s1 + $0xe8] sm:$0xff]  ;;  %v3165_v27 = vcombine.low %v51_v16, %v55_v17 }
   0x9   :  { %v3172_v28 = vcombine.high %v58_v22, %v62_v23  ;;  %v3174_v29 = vcombine.high %v59_v24, %v63_v25  ;;  %v66_v30 = vld [vmem:[%s5039_s1 + $0x100] sm:$0xff]  ;;  %v67_v32 = vld [vmem:[%s5039_s1 + $0x108] sm:$0xff]  ;;  %v3171_v34 = vcombine.low %v58_v22, %v62_v23  ;;  %v3173_v35 = vcombine.low %v59_v24, %v63_v25 }
   0xa   :  { %2413 = vmatpush1.bf16.msra.mxu0 %v3155_v18  ;;  %2542 = vmatpush1.bf16.msra.mxu1 %v3157_v19  ;;  %v70_v31 = vld [vmem:[%s5039_s1 + $0x120] sm:$0xff]  ;;  %v71_v33 = vld [vmem:[%s5039_s1 + $0x128] sm:$0xff] }
   0xb   :  { %2414 = vmatprep.subr.bf16.mxu0 %v3164_v20  ;;  %2543 = vmatprep.subr.bf16.mxu1 %v3166_v21  ;;  %v3180_v36 = vcombine.high %v66_v30, %v70_v31  ;;  %v3182_v37 = vcombine.high %v67_v32, %v71_v33  ;;  %v74_v38 = vld [vmem:[%s5039_s1 + $0x140] sm:$0xff]  ;;  %v75_v40 = vld [vmem:[%s5039_s1 + $0x148] sm:$0xff]  ;;  %v3179_v42 = vcombine.low %v66_v30, %v70_v31 }
   0xc   :  { %v78_v39 = vld [vmem:[%s5039_s1 + $0x160] sm:$0xff]  ;;  %v79_v41 = vld [vmem:[%s5039_s1 + $0x168] sm:$0xff]  ;;  %v3181_v43 = vcombine.low %v67_v32, %v71_v33 }
   0xd   :  { %v3188_v44 = vcombine.high %v74_v38, %v78_v39  ;;  %v3190_v45 = vcombine.high %v75_v40, %v79_v41  ;;  %v82_v46 = vld [vmem:[%s5039_s1 + $0x180] sm:$0xff]  ;;  %v83_v48 = vld [vmem:[%s5039_s1 + $0x188] sm:$0xff]  ;;  %v3187_v50 = vcombine.low %v74_v38, %v78_v39  ;;  %v3189_v51 = vcombine.low %v75_v40, %v79_v41 }
   0xe   :  { %2415 = vmatpush1.bf16.msra.mxu0 %v3163_v26  ;;  %2544 = vmatpush1.bf16.msra.mxu1 %v3165_v27  ;;  %v86_v47 = vld [vmem:[%s5039_s1 + $0x1a0] sm:$0xff]  ;;  %v87_v49 = vld [vmem:[%s5039_s1 + $0x1a8] sm:$0xff] }
   0xf   :  { %2416 = vmatprep.subr.bf16.mxu0 %v3172_v28  ;;  %2545 = vmatprep.subr.bf16.mxu1 %v3174_v29  ;;  %v3196_v52 = vcombine.high %v82_v46, %v86_v47  ;;  %v3198_v53 = vcombine.high %v83_v48, %v87_v49  ;;  %v90_v54 = vld [vmem:[%s5039_s1 + $0x1c0] sm:$0xff]  ;;  %v91_v57 = vld [vmem:[%s5039_s1 + $0x1c8] sm:$0xff]  ;;  %v3195_v59 = vcombine.low %v82_v46, %v86_v47 }
  0x10   :  { %v94_v55 = vld [vmem:[%s5039_s1 + $0x1e0] sm:$0xff]  ;;  %v95_v58 = vld [vmem:[%s5039_s1 + $0x1e8] sm:$0xff]  ;;  %v3197_v60 = vcombine.low %v83_v48, %v87_v49 }
  0x11   :  { %v3584_v56 = vld [vmem:[%s5040_s0 + $0x4] ss:$24 sps:$4 sm:$0xff]   ;;  %v3204_v61 = vcombine.high %v90_v54, %v94_v55  ;;  %v3206_v62 = vcombine.high %v91_v57, %v95_v58  ;;  %v99_v1 = vld [vmem:[%s5039_s1 + $0x208] sm:$0xff]  ;;  %v3203_v3 = vcombine.low %v90_v54, %v94_v55  ;;  %v3205_v4 = vcombine.low %v91_v57, %v95_v58 }
  0x12   :  { %2417 = vmatpush1.bf16.msra.mxu0 %v3171_v34  ;;  %2546 = vmatpush1.bf16.msra.mxu1 %v3173_v35  ;;  %v98_v63 = vld [vmem:[%s5039_s1 + $0x200] sm:$0xff]  ;;  %v103_v2 = vld [vmem:[%s5039_s1 + $0x228] sm:$0xff] }
  0x13   :  { %2418 = vmatprep.subr.bf16.mxu0 %v3180_v36  ;;  %2547 = vmatprep.subr.bf16.mxu1 %v3182_v37  ;;  %v102_v0 = vld [vmem:[%s5039_s1 + $0x220] sm:$0xff]  ;;  %v3214_v6 = vcombine.high %v99_v1, %v103_v2  ;;  %v107_v9 = vld [vmem:[%s5039_s1 + $0x248] sm:$0xff]  ;;  %v3213_v12 = vcombine.low %v99_v1, %v103_v2 }
  0x14   :  { %2442 = vmatprep.mubr.bf16.mxu0 %v3584_v56  ;;  %2571 = vmatprep.mubr.bf16.mxu1 %v3584_v56  ;;  %v3212_v5 = vcombine.high %v98_v63, %v102_v0  ;;  %v106_v7 = vld [vmem:[%s5039_s1 + $0x240] sm:$0xff]  ;;  %v111_v10 = vld [vmem:[%s5039_s1 + $0x268] sm:$0xff]  ;;  %v3211_v11 = vcombine.low %v98_v63, %v102_v0 }
  0x15   :  { %v110_v8 = vld [vmem:[%s5039_s1 + $0x260] sm:$0xff]  ;;  %v3222_v14 = vcombine.high %v107_v9, %v111_v10  ;;  %v115_v17 = vld [vmem:[%s5039_s1 + $0x288] sm:$0xff]  ;;  %v3221_v20 = vcombine.low %v107_v9, %v111_v10 }
  0x16   :  { %2419 = vmatpush1.bf16.msra.mxu0 %v3179_v42  ;;  %2548 = vmatpush1.bf16.msra.mxu1 %v3181_v43  ;;  %v3220_v13 = vcombine.high %v106_v7, %v110_v8  ;;  %v114_v15 = vld [vmem:[%s5039_s1 + $0x280] sm:$0xff]  ;;  %v119_v18 = vld [vmem:[%s5039_s1 + $0x2a8] sm:$0xff]  ;;  %v3219_v19 = vcombine.low %v106_v7, %v110_v8 }
  0x17   :  { %2420 = vmatprep.subr.bf16.mxu0 %v3188_v44  ;;  %2549 = vmatprep.subr.bf16.mxu1 %v3190_v45  ;;  %v118_v16 = vld [vmem:[%s5039_s1 + $0x2a0] sm:$0xff]  ;;  %v3230_v22 = vcombine.high %v115_v17, %v119_v18  ;;  %v123_v25 = vld [vmem:[%s5039_s1 + $0x2c8] sm:$0xff]  ;;  %v3229_v28 = vcombine.low %v115_v17, %v119_v18 }
  0x18   :  { %v3228_v21 = vcombine.high %v114_v15, %v118_v16  ;;  %v122_v23 = vld [vmem:[%s5039_s1 + $0x2c0] sm:$0xff]  ;;  %v127_v26 = vld [vmem:[%s5039_s1 + $0x2e8] sm:$0xff]  ;;  %v3227_v27 = vcombine.low %v114_v15, %v118_v16 }
  0x19   :  { %v126_v24 = vld [vmem:[%s5039_s1 + $0x2e0] sm:$0xff]  ;;  %v3238_v30 = vcombine.high %v123_v25, %v127_v26  ;;  %v131_v33 = vld [vmem:[%s5039_s1 + $0x308] sm:$0xff]  ;;  %v3237_v36 = vcombine.low %v123_v25, %v127_v26 }
  0x1a   :  { %2421 = vmatpush1.bf16.msra.mxu0 %v3187_v50  ;;  %2550 = vmatpush1.bf16.msra.mxu1 %v3189_v51  ;;  %v3236_v29 = vcombine.high %v122_v23, %v126_v24  ;;  %v130_v31 = vld [vmem:[%s5039_s1 + $0x300] sm:$0xff]  ;;  %v135_v34 = vld [vmem:[%s5039_s1 + $0x328] sm:$0xff]  ;;  %v3235_v35 = vcombine.low %v122_v23, %v126_v24 }
  0x1b   :  { %2422 = vmatprep.subr.bf16.mxu0 %v3196_v52  ;;  %2551 = vmatprep.subr.bf16.mxu1 %v3198_v53  ;;  %v134_v32 = vld [vmem:[%s5039_s1 + $0x320] sm:$0xff]  ;;  %v3246_v38 = vcombine.high %v131_v33, %v135_v34  ;;  %v139_v41 = vld [vmem:[%s5039_s1 + $0x348] sm:$0xff]  ;;  %v3245_v44 = vcombine.low %v131_v33, %v135_v34 }
  0x1c   :  { %v3244_v37 = vcombine.high %v130_v31, %v134_v32  ;;  %v138_v39 = vld [vmem:[%s5039_s1 + $0x340] sm:$0xff]  ;;  %v143_v42 = vld [vmem:[%s5039_s1 + $0x368] sm:$0xff]  ;;  %v3243_v43 = vcombine.low %v130_v31, %v134_v32 }
  0x1d   :  { %v142_v40 = vld [vmem:[%s5039_s1 + $0x360] sm:$0xff]  ;;  %v3254_v46 = vcombine.high %v139_v41, %v143_v42  ;;  %v147_v49 = vld [vmem:[%s5039_s1 + $0x388] sm:$0xff]  ;;  %v3253_v52 = vcombine.low %v139_v41, %v143_v42 }
  0x1e   :  { %2423 = vmatpush1.bf16.msra.mxu0 %v3195_v59  ;;  %2552 = vmatpush1.bf16.msra.mxu1 %v3197_v60  ;;  %v3252_v45 = vcombine.high %v138_v39, %v142_v40  ;;  %v146_v47 = vld [vmem:[%s5039_s1 + $0x380] sm:$0xff]  ;;  %v151_v50 = vld [vmem:[%s5039_s1 + $0x3a8] sm:$0xff]  ;;  %v3251_v51 = vcombine.low %v138_v39, %v142_v40 }
  0x1f   :  { %2424 = vmatprep.subr.bf16.mxu0 %v3204_v61  ;;  %2553 = vmatprep.subr.bf16.mxu1 %v3206_v62  ;;  %v150_v48 = vld [vmem:[%s5039_s1 + $0x3a0] sm:$0xff]  ;;  %v3262_v54 = vcombine.high %v147_v49, %v151_v50  ;;  %v155_v57 = vld [vmem:[%s5039_s1 + $0x3c8] sm:$0xff]  ;;  %v3261_v60 = vcombine.low %v147_v49, %v151_v50 }
  0x20   :  { %v3260_v53 = vcombine.high %v146_v47, %v150_v48  ;;  %v154_v55 = vld [vmem:[%s5039_s1 + $0x3c0] sm:$0xff]  ;;  %v159_v58 = vld [vmem:[%s5039_s1 + $0x3e8] sm:$0xff]  ;;  %v3259_v59 = vcombine.low %v146_v47, %v150_v48 }
  0x21   :  { %v158_v56 = vld [vmem:[%s5039_s1 + $0x3e0] sm:$0xff]  ;;  %v3270_v62 = vcombine.high %v155_v57, %v159_v58  ;;  %v163_v1 = vld [vmem:[%s5039_s1 + $0x408] sm:$0xff] }
  0x22   :  { %2425 = vmatpush1.bf16.msra.mxu0 %v3203_v3  ;;  %2554 = vmatpush1.bf16.msra.mxu1 %v3205_v4  ;;  %v3268_v61 = vcombine.high %v154_v55, %v158_v56  ;;  %v162_v63 = vld [vmem:[%s5039_s1 + $0x400] sm:$0xff]  ;;  %v167_v2 = vld [vmem:[%s5039_s1 + $0x428] sm:$0xff]  ;;  %v3267_v3 = vcombine.low %v154_v55, %v158_v56  ;;  %v3269_v4 = vcombine.low %v155_v57, %v159_v58 }
  0x23   :  { %2426 = vmatprep.subr.bf16.mxu0 %v3212_v5  ;;  %2555 = vmatprep.subr.bf16.mxu1 %v3214_v6  ;;  %v166_v0 = vld [vmem:[%s5039_s1 + $0x420] sm:$0xff]  ;;  %v3278_v6 = vcombine.high %v163_v1, %v167_v2  ;;  %v171_v10 = vld [vmem:[%s5039_s1 + $0x448] sm:$0xff] }
  0x24   :  { %v3276_v5 = vcombine.high %v162_v63, %v166_v0  ;;  %v170_v7 = vld [vmem:[%s5039_s1 + $0x440] sm:$0xff] }
  0x25   :  { %v174_v8 = vld [vmem:[%s5039_s1 + $0x460] sm:$0xff] }
  0x26   :  { %2427 = vmatpush1.bf16.msra.mxu0 %v3211_v11  ;;  %2556 = vmatpush1.bf16.msra.mxu1 %v3213_v12  ;;  %v3586_v9 = vld [vmem:[%s5040_s0] ss:$24 sps:$4 sm:$0xff]   ;;  %v175_v11 = vld [vmem:[%s5039_s1 + $0x468] sm:$0xff]  ;;  %v3275_v12 = vcombine.low %v162_v63, %v166_v0 }
  0x27   :  { %2428 = vmatprep.subr.bf16.mxu0 %v3220_v13  ;;  %2557 = vmatprep.subr.bf16.mxu1 %v3222_v14  ;;  %v3277_v13 = vcombine.low %v163_v1, %v167_v2  ;;  %v3284_v14 = vcombine.high %v170_v7, %v174_v8  ;;  %v178_v15 = vld [vmem:[%s5039_s1 + $0x480] sm:$0xff]  ;;  %v3286_v16 = vcombine.high %v171_v10, %v175_v11 }
  0x28   :  { %v182_v17 = vld [vmem:[%s5039_s1 + $0x4a0] sm:$0xff] }
  0x29   :  { %v3587_v18 = vld [vmem:[%s5040_s0 + $0xc] ss:$24 sps:$4 sm:$0xff]   ;;  %v3292_v23 = vcombine.high %v178_v15, %v182_v17 }
  0x2a   :  { %2429 = vmatpush1.bf16.msra.mxu0 %v3219_v19  ;;  %2558 = vmatpush1.bf16.msra.mxu1 %v3221_v20  ;;  %v179_v19 = vld [vmem:[%s5039_s1 + $0x488] sm:$0xff]  ;;  %v186_v25 = vld [vmem:[%s5039_s1 + $0x4c0] sm:$0xff] }
  0x2b   :  { %2430 = vmatprep.subr.bf16.mxu0 %v3228_v21  ;;  %2559 = vmatprep.subr.bf16.mxu1 %v3230_v22  ;;  %v183_v20 = vld [vmem:[%s5039_s1 + $0x4a8] sm:$0xff]  ;;  %v3283_v21 = vcombine.low %v170_v7, %v174_v8  ;;  %v3285_v22 = vcombine.low %v171_v10, %v175_v11  ;;  %v190_v26 = vld [vmem:[%s5039_s1 + $0x4e0] sm:$0xff] }
  0x2c   :  { %v3294_v24 = vcombine.high %v179_v19, %v183_v20  ;;  %v3300_v31 = vcombine.high %v186_v25, %v190_v26  ;;  %v194_v33 = vld [vmem:[%s5039_s1 + $0x500] sm:$0xff]  ;;  %v235_v11 = vld [vmem:[%s5039_s1 + $0x648] sm:$0xff] }
  0x2d   :  { %v198_v34 = vld [vmem:[%s5039_s1 + $0x520] sm:$0xff] }
  0x2e   :  { %2431 = vmatpush1.bf16.msra.mxu0 %v3227_v27  ;;  %2560 = vmatpush1.bf16.msra.mxu1 %v3229_v28  ;;  %v187_v27 = vld [vmem:[%s5039_s1 + $0x4c8] sm:$0xff]  ;;  %v3308_v39 = vcombine.high %v194_v33, %v198_v34  ;;  %v202_v41 = vld [vmem:[%s5039_s1 + $0x540] sm:$0xff] }
  0x2f   :  { %2432 = vmatprep.subr.bf16.mxu0 %v3236_v29  ;;  %2561 = vmatprep.subr.bf16.mxu1 %v3238_v30  ;;  %v191_v28 = vld [vmem:[%s5039_s1 + $0x4e8] sm:$0xff]  ;;  %v3291_v29 = vcombine.low %v178_v15, %v182_v17  ;;  %v3293_v30 = vcombine.low %v179_v19, %v183_v20  ;;  %v206_v42 = vld [vmem:[%s5039_s1 + $0x560] sm:$0xff] }
  0x30   :  { %v3302_v32 = vcombine.high %v187_v27, %v191_v28  ;;  %v3316_v47 = vcombine.high %v202_v41, %v206_v42  ;;  %v210_v49 = vld [vmem:[%s5039_s1 + $0x580] sm:$0xff]  ;;  %v243_v19 = vld [vmem:[%s5039_s1 + $0x688] sm:$0xff] }
  0x31   :  { %v214_v50 = vld [vmem:[%s5039_s1 + $0x5a0] sm:$0xff]  ;;  %v247_v20 = vld [vmem:[%s5039_s1 + $0x6a8] sm:$0xff] }
  0x32   :  { %2433 = vmatpush1.bf16.msra.mxu0 %v3235_v35  ;;  %2562 = vmatpush1.bf16.msra.mxu1 %v3237_v36  ;;  %v195_v35 = vld [vmem:[%s5039_s1 + $0x508] sm:$0xff]  ;;  %v3324_v55 = vcombine.high %v210_v49, %v214_v50  ;;  %v218_v57 = vld [vmem:[%s5039_s1 + $0x5c0] sm:$0xff] }
  0x33   :  { %2434 = vmatprep.subr.bf16.mxu0 %v3244_v37  ;;  %2563 = vmatprep.subr.bf16.mxu1 %v3246_v38  ;;  %v199_v36 = vld [vmem:[%s5039_s1 + $0x528] sm:$0xff]  ;;  %v3299_v37 = vcombine.low %v186_v25, %v190_v26  ;;  %v3301_v38 = vcombine.low %v187_v27, %v191_v28  ;;  %v222_v58 = vld [vmem:[%s5039_s1 + $0x5e0] sm:$0xff] }
  0x34   :  { %v3310_v40 = vcombine.high %v195_v35, %v199_v36  ;;  %v3332_v63 = vcombine.high %v218_v57, %v222_v58  ;;  %v226_v1 = vld [vmem:[%s5039_s1 + $0x600] sm:$0xff]  ;;  %v251_v27 = vld [vmem:[%s5039_s1 + $0x6c8] sm:$0xff] }
  0x35   :  { %v230_v2 = vld [vmem:[%s5039_s1 + $0x620] sm:$0xff]  ;;  %v255_v28 = vld [vmem:[%s5039_s1 + $0x6e8] sm:$0xff] }
  0x36   :  { %2435 = vmatpush1.bf16.msra.mxu0 %v3243_v43  ;;  %2564 = vmatpush1.bf16.msra.mxu1 %v3245_v44  ;;  %v203_v43 = vld [vmem:[%s5039_s1 + $0x548] sm:$0xff]  ;;  %v3340_v7 = vcombine.high %v226_v1, %v230_v2  ;;  %v238_v10 = vld [vmem:[%s5039_s1 + $0x660] sm:$0xff] }
  0x37   :  { %2436 = vmatprep.subr.bf16.mxu0 %v3252_v45  ;;  %2565 = vmatprep.subr.bf16.mxu1 %v3254_v46  ;;  %v207_v44 = vld [vmem:[%s5039_s1 + $0x568] sm:$0xff]  ;;  %v3307_v45 = vcombine.low %v194_v33, %v198_v34  ;;  %v3309_v46 = vcombine.low %v195_v35, %v199_v36  ;;  %v242_v17 = vld [vmem:[%s5039_s1 + $0x680] sm:$0xff] }
  0x38   :  { %v3318_v48 = vcombine.high %v203_v43, %v207_v44  ;;  %v250_v25 = vld [vmem:[%s5039_s1 + $0x6c0] sm:$0xff]  ;;  %v259_v35 = vld [vmem:[%s5039_s1 + $0x708] sm:$0xff] }
  0x39   :  { %v254_v26 = vld [vmem:[%s5039_s1 + $0x6e0] sm:$0xff]  ;;  %v263_v36 = vld [vmem:[%s5039_s1 + $0x728] sm:$0xff] }
  0x3a   :  { %2437 = vmatpush1.bf16.msra.mxu0 %v3251_v51  ;;  %2566 = vmatpush1.bf16.msra.mxu1 %v3253_v52  ;;  %v211_v51 = vld [vmem:[%s5039_s1 + $0x588] sm:$0xff]  ;;  %v258_v33 = vld [vmem:[%s5039_s1 + $0x700] sm:$0xff] }
  0x3b   :  { %2438 = vmatprep.subr.bf16.mxu0 %v3260_v53  ;;  %2567 = vmatprep.subr.bf16.mxu1 %v3262_v54  ;;  %v215_v52 = vld [vmem:[%s5039_s1 + $0x5a8] sm:$0xff]  ;;  %v3315_v53 = vcombine.low %v202_v41, %v206_v42  ;;  %v3317_v54 = vcombine.low %v203_v43, %v207_v44  ;;  %v262_v34 = vld [vmem:[%s5039_s1 + $0x720] sm:$0xff] }
  0x3c   :  { %v3326_v56 = vcombine.high %v211_v51, %v215_v52  ;;  %v266_v41 = vld [vmem:[%s5039_s1 + $0x740] sm:$0xff]  ;;  %v267_v43 = vld [vmem:[%s5039_s1 + $0x748] sm:$0xff] }
  0x3d   :  { %v270_v42 = vld [vmem:[%s5039_s1 + $0x760] sm:$0xff]  ;;  %v271_v44 = vld [vmem:[%s5039_s1 + $0x768] sm:$0xff] }
  0x3e   :  { %2439 = vmatpush1.bf16.msra.mxu0 %v3259_v59  ;;  %2568 = vmatpush1.bf16.msra.mxu1 %v3261_v60  ;;  %v219_v59 = vld [vmem:[%s5039_s1 + $0x5c8] sm:$0xff] }
  0x3f   :  { %2440 = vmatprep.subr.bf16.mxu0 %v3268_v61  ;;  %2569 = vmatprep.subr.bf16.mxu1 %v3270_v62  ;;  %v223_v60 = vld [vmem:[%s5039_s1 + $0x5e8] sm:$0xff]  ;;  %v3323_v61 = vcombine.low %v210_v49, %v214_v50  ;;  %v3325_v62 = vcombine.low %v211_v51, %v215_v52  ;;  %v274_v49 = vld [vmem:[%s5039_s1 + $0x780] sm:$0xff] }
  0x40   :  { %v3334_v0 = vcombine.high %v219_v59, %v223_v60  ;;  %v278_v50 = vld [vmem:[%s5039_s1 + $0x7a0] sm:$0xff]  ;;  %v275_v51 = vld [vmem:[%s5039_s1 + $0x788] sm:$0xff] }
  0x41   :  { %v279_v52 = vld [vmem:[%s5039_s1 + $0x7a8] sm:$0xff] }
  0x42   :  { %2441 = vmatpush1.bf16.msra.mxu0 %v3267_v3  ;;  %2570 = vmatpush1.bf16.msra.mxu1 %v3269_v4  ;;  %v227_v3 = vld [vmem:[%s5039_s1 + $0x608] sm:$0xff] }
  0x43   :  { %2453 = vmatprep.subr.bf16.mxu0 %v3276_v5  ;;  %2582 = vmatprep.subr.bf16.mxu1 %v3278_v6  ;;  %v231_v4 = vld [vmem:[%s5039_s1 + $0x628] sm:$0xff]  ;;  %v3331_v5 = vcombine.low %v218_v57, %v222_v58  ;;  %v3333_v6 = vcombine.low %v219_v59, %v223_v60  ;;  %v282_v57 = vld [vmem:[%s5039_s1 + $0x7c0] sm:$0xff] }
  0x44   :  { %v3342_v8 = vcombine.high %v227_v3, %v231_v4  ;;  %v286_v58 = vld [vmem:[%s5039_s1 + $0x7e0] sm:$0xff]  ;;  %v283_v59 = vld [vmem:[%s5039_s1 + $0x7c8] sm:$0xff] }
  0x45   :  { %2443 = vmatmul.mubr.bf16.vlgmr.msra.gmra.mrb[0].mxu0 %v3586_v9  ;;  %2572 = vmatmul.mubr.bf16.vlgmr.msra.gmra.mrb[0].mxu1 %v3586_v9  ;;  %v234_v9 = vld [vmem:[%s5039_s1 + $0x640] sm:$0xff]  ;;  %v287_v60 = vld [vmem:[%s5039_s1 + $0x7e8] sm:$0xff] }
  0x46   :  { %2454 = vmatpush1.bf16.msra.mxu0 %v3275_v12  ;;  %2583 = vmatpush1.bf16.msra.mxu1 %v3277_v13  ;;  %v239_v12 = vld [vmem:[%s5039_s1 + $0x668] sm:$0xff]  ;;  %v3339_v13 = vcombine.low %v226_v1, %v230_v2  ;;  %v3348_v15 = vcombine.high %v234_v9, %v238_v10  ;;  %v290_v1 = vld [vmem:[%s5039_s1 + $0x800] sm:$0xff] }
  0x47   :  { %2455 = vmatprep.subr.bf16.mxu0 %v3284_v14  ;;  %2584 = vmatprep.subr.bf16.mxu1 %v3286_v16  ;;  %v3341_v14 = vcombine.low %v227_v3, %v231_v4  ;;  %v3350_v16 = vcombine.high %v235_v11, %v239_v12  ;;  %v294_v2 = vld [vmem:[%s5039_s1 + $0x820] sm:$0xff]  ;;  %v291_v3 = vld [vmem:[%s5039_s1 + $0x808] sm:$0xff] }
  0x48   :  { %2485 = vmatprep.mubr.bf16.mxu0 %v3587_v18  ;;  %2614 = vmatprep.mubr.bf16.mxu1 %v3587_v18  ;;  %v246_v18 = vld [vmem:[%s5039_s1 + $0x6a0] sm:$0xff]  ;;  %v295_v4 = vld [vmem:[%s5039_s1 + $0x828] sm:$0xff] }
  0x4a   :  { %2456 = vmatpush1.bf16.msra.mxu0 %v3283_v21  ;;  %2585 = vmatpush1.bf16.msra.mxu1 %v3285_v22  ;;  %v3347_v21 = vcombine.low %v234_v9, %v238_v10  ;;  %v3349_v22 = vcombine.low %v235_v11, %v239_v12  ;;  %v298_v9 = vld [vmem:[%s5039_s1 + $0x840] sm:$0xff]  ;;  %v299_v12 = vld [vmem:[%s5039_s1 + $0x848] sm:$0xff] }
  0x4b   :  { %2457 = vmatprep.subr.bf16.mxu0 %v3292_v23  ;;  %2586 = vmatprep.subr.bf16.mxu1 %v3294_v24  ;;  %v3356_v23 = vcombine.high %v242_v17, %v246_v18  ;;  %v3358_v24 = vcombine.high %v243_v19, %v247_v20  ;;  %v302_v10 = vld [vmem:[%s5039_s1 + $0x860] sm:$0xff] }
  0x4c   :  { %v3589_v11 = vld [vmem:[%s5040_s0 + $0x8] ss:$24 sps:$4 sm:$0xff]  }
  0x4e   :  { %2458 = vmatpush1.bf16.msra.mxu0 %v3291_v29  ;;  %2587 = vmatpush1.bf16.msra.mxu1 %v3293_v30  ;;  %v3355_v29 = vcombine.low %v242_v17, %v246_v18  ;;  %v3357_v30 = vcombine.low %v243_v19, %v247_v20  ;;  %v306_v18 = vld [vmem:[%s5039_s1 + $0x880] sm:$0xff]  ;;  %v3590_v20 = vld [vmem:[%s5040_s0 + $0x14] ss:$24 sps:$4 sm:$0xff]  }
  0x4f   :  { %2459 = vmatprep.subr.bf16.mxu0 %v3300_v31  ;;  %2588 = vmatprep.subr.bf16.mxu1 %v3302_v32  ;;  %v3364_v31 = vcombine.high %v250_v25, %v254_v26  ;;  %v3366_v32 = vcombine.high %v251_v27, %v255_v28  ;;  %v310_v19 = vld [vmem:[%s5039_s1 + $0x8a0] sm:$0xff] }
  0x52   :  { %2460 = vmatpush1.bf16.msra.mxu0 %v3299_v37  ;;  %2589 = vmatpush1.bf16.msra.mxu1 %v3301_v38  ;;  %v3363_v37 = vcombine.low %v250_v25, %v254_v26  ;;  %v3365_v38 = vcombine.low %v251_v27, %v255_v28  ;;  %v3420_v25 = vcombine.high %v306_v18, %v310_v19  ;;  %v314_v27 = vld [vmem:[%s5039_s1 + $0x8c0] sm:$0xff] }
  0x53   :  { %2461 = vmatprep.subr.bf16.mxu0 %v3308_v39  ;;  %2590 = vmatprep.subr.bf16.mxu1 %v3310_v40  ;;  %v3372_v39 = vcombine.high %v258_v33, %v262_v34  ;;  %v3374_v40 = vcombine.high %v259_v35, %v263_v36  ;;  %v318_v28 = vld [vmem:[%s5039_s1 + $0x8e0] sm:$0xff] }
  0x56   :  { %2462 = vmatpush1.bf16.msra.mxu0 %v3307_v45  ;;  %2591 = vmatpush1.bf16.msra.mxu1 %v3309_v46  ;;  %v3371_v45 = vcombine.low %v258_v33, %v262_v34  ;;  %v3373_v46 = vcombine.low %v259_v35, %v263_v36  ;;  %v3428_v33 = vcombine.high %v314_v27, %v318_v28  ;;  %v322_v35 = vld [vmem:[%s5039_s1 + $0x900] sm:$0xff] }
  0x57   :  { %2463 = vmatprep.subr.bf16.mxu0 %v3316_v47  ;;  %2592 = vmatprep.subr.bf16.mxu1 %v3318_v48  ;;  %v3380_v47 = vcombine.high %v266_v41, %v270_v42  ;;  %v3382_v48 = vcombine.high %v267_v43, %v271_v44  ;;  %v326_v36 = vld [vmem:[%s5039_s1 + $0x920] sm:$0xff] }
  0x5a   :  { %2464 = vmatpush1.bf16.msra.mxu0 %v3315_v53  ;;  %2593 = vmatpush1.bf16.msra.mxu1 %v3317_v54  ;;  %v3379_v53 = vcombine.low %v266_v41, %v270_v42  ;;  %v3381_v54 = vcombine.low %v267_v43, %v271_v44  ;;  %v3436_v41 = vcombine.high %v322_v35, %v326_v36  ;;  %v330_v43 = vld [vmem:[%s5039_s1 + $0x940] sm:$0xff] }
  0x5b   :  { %2465 = vmatprep.subr.bf16.mxu0 %v3324_v55  ;;  %2594 = vmatprep.subr.bf16.mxu1 %v3326_v56  ;;  %v3388_v55 = vcombine.high %v274_v49, %v278_v50  ;;  %v3390_v56 = vcombine.high %v275_v51, %v279_v52  ;;  %v334_v44 = vld [vmem:[%s5039_s1 + $0x960] sm:$0xff] }
  0x5e   :  { %2466 = vmatpush1.bf16.msra.mxu0 %v3323_v61  ;;  %2595 = vmatpush1.bf16.msra.mxu1 %v3325_v62  ;;  %v3387_v61 = vcombine.low %v274_v49, %v278_v50  ;;  %v3389_v62 = vcombine.low %v275_v51, %v279_v52  ;;  %v3444_v49 = vcombine.high %v330_v43, %v334_v44  ;;  %v338_v51 = vld [vmem:[%s5039_s1 + $0x980] sm:$0xff] }
  0x5f   :  { %2467 = vmatprep.subr.bf16.mxu0 %v3332_v63  ;;  %2596 = vmatprep.subr.bf16.mxu1 %v3334_v0  ;;  %v3396_v63 = vcombine.high %v282_v57, %v286_v58  ;;  %v3398_v0 = vcombine.high %v283_v59, %v287_v60  ;;  %v342_v52 = vld [vmem:[%s5039_s1 + $0x9a0] sm:$0xff] }
  0x62   :  { %2468 = vmatpush1.bf16.msra.mxu0 %v3331_v5  ;;  %2597 = vmatpush1.bf16.msra.mxu1 %v3333_v6  ;;  %v3395_v5 = vcombine.low %v282_v57, %v286_v58  ;;  %v3397_v6 = vcombine.low %v283_v59, %v287_v60  ;;  %v3452_v57 = vcombine.high %v338_v51, %v342_v52  ;;  %v346_v59 = vld [vmem:[%s5039_s1 + $0x9c0] sm:$0xff] }
  0x63   :  { %2469 = vmatprep.subr.bf16.mxu0 %v3340_v7  ;;  %2598 = vmatprep.subr.bf16.mxu1 %v3342_v8  ;;  %v3404_v7 = vcombine.high %v290_v1, %v294_v2  ;;  %v3406_v8 = vcombine.high %v291_v3, %v295_v4  ;;  %v350_v60 = vld [vmem:[%s5039_s1 + $0x9e0] sm:$0xff] }
  0x66   :  { %2470 = vmatpush1.bf16.msra.mxu0 %v3339_v13  ;;  %2599 = vmatpush1.bf16.msra.mxu1 %v3341_v14  ;;  %v303_v13 = vld [vmem:[%s5039_s1 + $0x868] sm:$0xff]  ;;  %v3403_v14 = vcombine.low %v290_v1, %v294_v2  ;;  %v3460_v1 = vcombine.high %v346_v59, %v350_v60 }
  0x67   :  { %2471 = vmatprep.subr.bf16.mxu0 %v3348_v15  ;;  %2600 = vmatprep.subr.bf16.mxu1 %v3350_v16  ;;  %v3405_v15 = vcombine.low %v291_v3, %v295_v4  ;;  %v3412_v16 = vcombine.high %v298_v9, %v302_v10  ;;  %v3414_v17 = vcombine.high %v299_v12, %v303_v13  ;;  %v354_v3 = vld [vmem:[%s5039_s1 + $0xa00] sm:$0xff] }
  0x68   :  { %v358_v4 = vld [vmem:[%s5039_s1 + $0xa20] sm:$0xff] }
  0x6a   :  { %2472 = vmatpush1.bf16.msra.mxu0 %v3347_v21  ;;  %2601 = vmatpush1.bf16.msra.mxu1 %v3349_v22  ;;  %v307_v21 = vld [vmem:[%s5039_s1 + $0x888] sm:$0xff] }
  0x6b   :  { %2473 = vmatprep.subr.bf16.mxu0 %v3356_v23  ;;  %2602 = vmatprep.subr.bf16.mxu1 %v3358_v24  ;;  %v311_v22 = vld [vmem:[%s5039_s1 + $0x8a8] sm:$0xff]  ;;  %v3411_v23 = vcombine.low %v298_v9, %v302_v10  ;;  %v3413_v24 = vcombine.low %v299_v12, %v303_v13  ;;  %v3468_v9 = vcombine.high %v354_v3, %v358_v4  ;;  %v366_v12 = vld [vmem:[%s5039_s1 + $0xa60] sm:$0xff] }
  0x6c   :  { %v3422_v26 = vcombine.high %v307_v21, %v311_v22  ;;  %v363_v13 = vld [vmem:[%s5039_s1 + $0xa48] sm:$0xff] }
  0x6e   :  { %2474 = vmatpush1.bf16.msra.mxu0 %v3355_v29  ;;  %2603 = vmatpush1.bf16.msra.mxu1 %v3357_v30  ;;  %v315_v29 = vld [vmem:[%s5039_s1 + $0x8c8] sm:$0xff] }
  0x6f   :  { %2475 = vmatprep.subr.bf16.mxu0 %v3364_v31  ;;  %2604 = vmatprep.subr.bf16.mxu1 %v3366_v32  ;;  %v319_v30 = vld [vmem:[%s5039_s1 + $0x8e8] sm:$0xff]  ;;  %v3419_v31 = vcombine.low %v306_v18, %v310_v19  ;;  %v3421_v32 = vcombine.low %v307_v21, %v311_v22  ;;  %v370_v19 = vld [vmem:[%s5039_s1 + $0xa80] sm:$0xff] }
  0x70   :  { %v3430_v34 = vcombine.high %v315_v29, %v319_v30  ;;  %v371_v21 = vld [vmem:[%s5039_s1 + $0xa88] sm:$0xff] }
  0x71   :  { %v375_v22 = vld [vmem:[%s5039_s1 + $0xaa8] sm:$0xff] }
  0x72   :  { %2476 = vmatpush1.bf16.msra.mxu0 %v3363_v37  ;;  %2605 = vmatpush1.bf16.msra.mxu1 %v3365_v38  ;;  %v323_v37 = vld [vmem:[%s5039_s1 + $0x908] sm:$0xff] }
  0x73   :  { %2477 = vmatprep.subr.bf16.mxu0 %v3372_v39  ;;  %2606 = vmatprep.subr.bf16.mxu1 %v3374_v40  ;;  %v327_v38 = vld [vmem:[%s5039_s1 + $0x928] sm:$0xff]  ;;  %v3427_v39 = vcombine.low %v314_v27, %v318_v28  ;;  %v3429_v40 = vcombine.low %v315_v29, %v319_v30  ;;  %v378_v27 = vld [vmem:[%s5039_s1 + $0xac0] sm:$0xff] }
  0x74   :  { %v3438_v42 = vcombine.high %v323_v37, %v327_v38  ;;  %v382_v28 = vld [vmem:[%s5039_s1 + $0xae0] sm:$0xff]  ;;  %v379_v29 = vld [vmem:[%s5039_s1 + $0xac8] sm:$0xff] }
  0x75   :  { %v383_v30 = vld [vmem:[%s5039_s1 + $0xae8] sm:$0xff] }
  0x76   :  { %2478 = vmatpush1.bf16.msra.mxu0 %v3371_v45  ;;  %2607 = vmatpush1.bf16.msra.mxu1 %v3373_v46  ;;  %v331_v45 = vld [vmem:[%s5039_s1 + $0x948] sm:$0xff] }
  0x77   :  { %2479 = vmatprep.subr.bf16.mxu0 %v3380_v47  ;;  %2608 = vmatprep.subr.bf16.mxu1 %v3382_v48  ;;  %v335_v46 = vld [vmem:[%s5039_s1 + $0x968] sm:$0xff]  ;;  %v3435_v47 = vcombine.low %v322_v35, %v326_v36  ;;  %v3437_v48 = vcombine.low %v323_v37, %v327_v38  ;;  %v386_v35 = vld [vmem:[%s5039_s1 + $0xb00] sm:$0xff] }
  0x78   :  { %v3446_v50 = vcombine.high %v331_v45, %v335_v46  ;;  %v390_v36 = vld [vmem:[%s5039_s1 + $0xb20] sm:$0xff]  ;;  %v387_v37 = vld [vmem:[%s5039_s1 + $0xb08] sm:$0xff] }
  0x79   :  { %v391_v38 = vld [vmem:[%s5039_s1 + $0xb28] sm:$0xff] }
  0x7a   :  { %2480 = vmatpush1.bf16.msra.mxu0 %v3379_v53  ;;  %2609 = vmatpush1.bf16.msra.mxu1 %v3381_v54  ;;  %v339_v53 = vld [vmem:[%s5039_s1 + $0x988] sm:$0xff] }
  0x7b   :  { %2481 = vmatprep.subr.bf16.mxu0 %v3388_v55  ;;  %2610 = vmatprep.subr.bf16.mxu1 %v3390_v56  ;;  %v343_v54 = vld [vmem:[%s5039_s1 + $0x9a8] sm:$0xff]  ;;  %v3443_v55 = vcombine.low %v330_v43, %v334_v44  ;;  %v3445_v56 = vcombine.low %v331_v45, %v335_v46  ;;  %v394_v43 = vld [vmem:[%s5039_s1 + $0xb40] sm:$0xff] }
  0x7c   :  { %v3454_v58 = vcombine.high %v339_v53, %v343_v54  ;;  %v398_v44 = vld [vmem:[%s5039_s1 + $0xb60] sm:$0xff]  ;;  %v395_v45 = vld [vmem:[%s5039_s1 + $0xb48] sm:$0xff] }
  0x7d   :  { %v399_v46 = vld [vmem:[%s5039_s1 + $0xb68] sm:$0xff] }
  0x7e   :  { %2482 = vmatpush1.bf16.msra.mxu0 %v3387_v61  ;;  %2611 = vmatpush1.bf16.msra.mxu1 %v3389_v62  ;;  %v347_v61 = vld [vmem:[%s5039_s1 + $0x9c8] sm:$0xff] }
  0x7f   :  { %2483 = vmatprep.subr.bf16.mxu0 %v3396_v63  ;;  %2612 = vmatprep.subr.bf16.mxu1 %v3398_v0  ;;  %v351_v62 = vld [vmem:[%s5039_s1 + $0x9e8] sm:$0xff]  ;;  %v3451_v63 = vcombine.low %v338_v51, %v342_v52  ;;  %v3453_v0 = vcombine.low %v339_v53, %v343_v54  ;;  %v402_v51 = vld [vmem:[%s5039_s1 + $0xb80] sm:$0xff] }
  0x80   :  { %v3462_v2 = vcombine.high %v347_v61, %v351_v62  ;;  %v406_v52 = vld [vmem:[%s5039_s1 + $0xba0] sm:$0xff]  ;;  %v403_v53 = vld [vmem:[%s5039_s1 + $0xb88] sm:$0xff] }
  0x81   :  { %v407_v54 = vld [vmem:[%s5039_s1 + $0xba8] sm:$0xff] }
  0x82   :  { %2484 = vmatpush1.bf16.msra.mxu0 %v3395_v5  ;;  %2613 = vmatpush1.bf16.msra.mxu1 %v3397_v6  ;;  %v355_v5 = vld [vmem:[%s5039_s1 + $0xa08] sm:$0xff] }
  0x83   :  { %2496 = vmatprep.subr.bf16.mxu0 %v3404_v7  ;;  %2625 = vmatprep.subr.bf16.mxu1 %v3406_v8  ;;  %v359_v6 = vld [vmem:[%s5039_s1 + $0xa28] sm:$0xff]  ;;  %v3459_v7 = vcombine.low %v346_v59, %v350_v60  ;;  %v3461_v8 = vcombine.low %v347_v61, %v351_v62  ;;  %v410_v59 = vld [vmem:[%s5039_s1 + $0xbc0] sm:$0xff] }
  0x84   :  { %v3470_v10 = vcombine.high %v355_v5, %v359_v6  ;;  %v414_v60 = vld [vmem:[%s5039_s1 + $0xbe0] sm:$0xff]  ;;  %v411_v61 = vld [vmem:[%s5039_s1 + $0xbc8] sm:$0xff] }
  0x85   :  { %2486 = vmatmul.mubr.bf16.vlgmr.msra.gmra.mrb[0].mxu0 %v3589_v11  ;;  %2615 = vmatmul.mubr.bf16.vlgmr.msra.gmra.mrb[0].mxu1 %v3589_v11  ;;  %v362_v11 = vld [vmem:[%s5039_s1 + $0xa40] sm:$0xff]  ;;  %v415_v62 = vld [vmem:[%s5039_s1 + $0xbe8] sm:$0xff] }
  0x86   :  { %2497 = vmatpush1.bf16.msra.mxu0 %v3403_v14  ;;  %2626 = vmatpush1.bf16.msra.mxu1 %v3405_v15  ;;  %v367_v14 = vld [vmem:[%s5039_s1 + $0xa68] sm:$0xff]  ;;  %v3467_v15 = vcombine.low %v354_v3, %v358_v4  ;;  %v36_v3 = vld [vmem:[%s5039_s1 + $0x10] sm:$0xff] }
  0x87   :  { %2498 = vmatprep.subr.bf16.mxu0 %v3412_v16  ;;  %2627 = vmatprep.subr.bf16.mxu1 %v3414_v17  ;;  %v3469_v16 = vcombine.low %v355_v5, %v359_v6  ;;  %v3476_v17 = vcombine.high %v362_v11, %v366_v12  ;;  %v3478_v18 = vcombine.high %v363_v13, %v367_v14  ;;  %v40_v4 = vld [vmem:[%s5039_s1 + $0x30] sm:$0xff]  ;;  %v37_v5 = vld [vmem:[%s5039_s1 + $0x18] sm:$0xff] }
  0x88   :  { %2528 = vmatprep.mubr.bf16.mxu0 %v3590_v20  ;;  %2657 = vmatprep.mubr.bf16.mxu1 %v3590_v20  ;;  %v374_v20 = vld [vmem:[%s5039_s1 + $0xaa0] sm:$0xff]  ;;  %v41_v6 = vld [vmem:[%s5039_s1 + $0x38] sm:$0xff] }
  0x8a   :  { %2499 = vmatpush1.bf16.msra.mxu0 %v3411_v23  ;;  %2628 = vmatpush1.bf16.msra.mxu1 %v3413_v24  ;;  %v3475_v23 = vcombine.low %v362_v11, %v366_v12  ;;  %v3477_v24 = vcombine.low %v363_v13, %v367_v14  ;;  %v44_v11 = vld [vmem:[%s5039_s1 + $0x50] sm:$0xff]  ;;  %v45_v14 = vld [vmem:[%s5039_s1 + $0x58] sm:$0xff] }
  0x8b   :  { %2500 = vmatprep.subr.bf16.mxu0 %v3420_v25  ;;  %2629 = vmatprep.subr.bf16.mxu1 %v3422_v26  ;;  %v3484_v25 = vcombine.high %v370_v19, %v374_v20  ;;  %v3486_v26 = vcombine.high %v371_v21, %v375_v22  ;;  %v48_v12 = vld [vmem:[%s5039_s1 + $0x70] sm:$0xff] }
  0x8c   :  { %v3592_v13 = vld [vmem:[%s5040_s0 + $0x10] ss:$24 sps:$4 sm:$0xff]  }
  0x8e   :  { %2501 = vmatpush1.bf16.msra.mxu0 %v3419_v31  ;;  %2630 = vmatpush1.bf16.msra.mxu1 %v3421_v32  ;;  %v3483_v31 = vcombine.low %v370_v19, %v374_v20  ;;  %v3485_v32 = vcombine.low %v371_v21, %v375_v22  ;;  %v52_v20 = vld [vmem:[%s5039_s1 + $0x90] sm:$0xff]  ;;  %v53_v22 = vld [vmem:[%s5039_s1 + $0x98] sm:$0xff] }
  0x8f   :  { %2502 = vmatprep.subr.bf16.mxu0 %v3428_v33  ;;  %2631 = vmatprep.subr.bf16.mxu1 %v3430_v34  ;;  %v3492_v33 = vcombine.high %v378_v27, %v382_v28  ;;  %v3494_v34 = vcombine.high %v379_v29, %v383_v30  ;;  %v56_v21 = vld [vmem:[%s5039_s1 + $0xb0] sm:$0xff] }
  0x92   :  { %2503 = vmatpush1.bf16.msra.mxu0 %v3427_v39  ;;  %2632 = vmatpush1.bf16.msra.mxu1 %v3429_v40  ;;  %v3491_v39 = vcombine.low %v378_v27, %v382_v28  ;;  %v3493_v40 = vcombine.low %v379_v29, %v383_v30  ;;  %v60_v28 = vld [vmem:[%s5039_s1 + $0xd0] sm:$0xff]  ;;  %v3633_v30 = vld [vmem:[%s5040_s0 + $0x4] ss:$24 sps:$4 sm:$0xff]  }
  0x93   :  { %2504 = vmatprep.subr.bf16.mxu0 %v3436_v41  ;;  %2633 = vmatprep.subr.bf16.mxu1 %v3438_v42  ;;  %v3500_v41 = vcombine.high %v386_v35, %v390_v36  ;;  %v3502_v42 = vcombine.high %v387_v37, %v391_v38  ;;  %v64_v29 = vld [vmem:[%s5039_s1 + $0xf0] sm:$0xff] }
  0x96   :  { %2505 = vmatpush1.bf16.msra.mxu0 %v3435_v47  ;;  %2634 = vmatpush1.bf16.msra.mxu1 %v3437_v48  ;;  %v3499_v47 = vcombine.low %v386_v35, %v390_v36  ;;  %v3501_v48 = vcombine.low %v387_v37, %v391_v38  ;;  %v3176_v35 = vcombine.high %v60_v28, %v64_v29  ;;  %v68_v37 = vld [vmem:[%s5039_s1 + $0x110] sm:$0xff] }
  0x97   :  { %2506 = vmatprep.subr.bf16.mxu0 %v3444_v49  ;;  %2635 = vmatprep.subr.bf16.mxu1 %v3446_v50  ;;  %v3508_v49 = vcombine.high %v394_v43, %v398_v44  ;;  %v3510_v50 = vcombine.high %v395_v45, %v399_v46  ;;  %v72_v38 = vld [vmem:[%s5039_s1 + $0x130] sm:$0xff] }
  0x9a   :  { %2507 = vmatpush1.bf16.msra.mxu0 %v3443_v55  ;;  %2636 = vmatpush1.bf16.msra.mxu1 %v3445_v56  ;;  %v3507_v55 = vcombine.low %v394_v43, %v398_v44  ;;  %v3509_v56 = vcombine.low %v395_v45, %v399_v46  ;;  %v3184_v43 = vcombine.high %v68_v37, %v72_v38  ;;  %v76_v45 = vld [vmem:[%s5039_s1 + $0x150] sm:$0xff] }
  0x9b   :  { %2508 = vmatprep.subr.bf16.mxu0 %v3452_v57  ;;  %2637 = vmatprep.subr.bf16.mxu1 %v3454_v58  ;;  %v3516_v57 = vcombine.high %v402_v51, %v406_v52  ;;  %v3518_v58 = vcombine.high %v403_v53, %v407_v54  ;;  %v80_v46 = vld [vmem:[%s5039_s1 + $0x170] sm:$0xff] }
  0x9e   :  { %2509 = vmatpush1.bf16.msra.mxu0 %v3451_v63  ;;  %2638 = vmatpush1.bf16.msra.mxu1 %v3453_v0  ;;  %v3515_v63 = vcombine.low %v402_v51, %v406_v52  ;;  %v3517_v0 = vcombine.low %v403_v53, %v407_v54  ;;  %v3192_v51 = vcombine.high %v76_v45, %v80_v46  ;;  %v84_v53 = vld [vmem:[%s5039_s1 + $0x190] sm:$0xff] }
  0x9f   :  { %2510 = vmatprep.subr.bf16.mxu0 %v3460_v1  ;;  %2639 = vmatprep.subr.bf16.mxu1 %v3462_v2  ;;  %v3524_v1 = vcombine.high %v410_v59, %v414_v60  ;;  %v3526_v2 = vcombine.high %v411_v61, %v415_v62  ;;  %v88_v54 = vld [vmem:[%s5039_s1 + $0x1b0] sm:$0xff] }
  0xa2   :  { %2511 = vmatpush1.bf16.msra.mxu0 %v3459_v7  ;;  %2640 = vmatpush1.bf16.msra.mxu1 %v3461_v8  ;;  %v3523_v7 = vcombine.low %v410_v59, %v414_v60  ;;  %v3525_v8 = vcombine.low %v411_v61, %v415_v62  ;;  %v3200_v59 = vcombine.high %v84_v53, %v88_v54  ;;  %v92_v61 = vld [vmem:[%s5039_s1 + $0x1d0] sm:$0xff] }
  0xa3   :  { %2512 = vmatprep.subr.bf16.mxu0 %v3468_v9  ;;  %2641 = vmatprep.subr.bf16.mxu1 %v3470_v10  ;;  %v3152_v9 = vcombine.high %v36_v3, %v40_v4  ;;  %v3154_v10 = vcombine.high %v37_v5, %v41_v6  ;;  %v96_v62 = vld [vmem:[%s5039_s1 + $0x1f0] sm:$0xff] }
  0xa6   :  { %2513 = vmatpush1.bf16.msra.mxu0 %v3467_v15  ;;  %2642 = vmatpush1.bf16.msra.mxu1 %v3469_v16  ;;  %v49_v15 = vld [vmem:[%s5039_s1 + $0x78] sm:$0xff]  ;;  %v3151_v16 = vcombine.low %v36_v3, %v40_v4  ;;  %v3208_v3 = vcombine.high %v92_v61, %v96_v62 }
  0xa7   :  { %2514 = vmatprep.subr.bf16.mxu0 %v3476_v17  ;;  %2643 = vmatprep.subr.bf16.mxu1 %v3478_v18  ;;  %v3153_v17 = vcombine.low %v37_v5, %v41_v6  ;;  %v3160_v18 = vcombine.high %v44_v11, %v48_v12  ;;  %v3162_v19 = vcombine.high %v45_v14, %v49_v15  ;;  %v100_v5 = vld [vmem:[%s5039_s1 + $0x210] sm:$0xff] }
  0xa8   :  { %v104_v6 = vld [vmem:[%s5039_s1 + $0x230] sm:$0xff] }
  0xaa   :  { %2515 = vmatpush1.bf16.msra.mxu0 %v3475_v23  ;;  %2644 = vmatpush1.bf16.msra.mxu1 %v3477_v24  ;;  %v57_v23 = vld [vmem:[%s5039_s1 + $0xb8] sm:$0xff]  ;;  %v3159_v24 = vcombine.low %v44_v11, %v48_v12  ;;  %v3216_v11 = vcombine.high %v100_v5, %v104_v6 }
  0xab   :  { %2516 = vmatprep.subr.bf16.mxu0 %v3484_v25  ;;  %2645 = vmatprep.subr.bf16.mxu1 %v3486_v26  ;;  %v3161_v25 = vcombine.low %v45_v14, %v49_v15  ;;  %v3168_v26 = vcombine.high %v52_v20, %v56_v21  ;;  %v3170_v27 = vcombine.high %v53_v22, %v57_v23  ;;  %v112_v14 = vld [vmem:[%s5039_s1 + $0x270] sm:$0xff]  ;;  %v109_v15 = vld [vmem:[%s5039_s1 + $0x258] sm:$0xff] }
  0xae   :  { %2517 = vmatpush1.bf16.msra.mxu0 %v3483_v31  ;;  %2646 = vmatpush1.bf16.msra.mxu1 %v3485_v32  ;;  %v61_v31 = vld [vmem:[%s5039_s1 + $0xd8] sm:$0xff] }
  0xaf   :  { %2518 = vmatprep.subr.bf16.mxu0 %v3492_v33  ;;  %2647 = vmatprep.subr.bf16.mxu1 %v3494_v34  ;;  %v65_v32 = vld [vmem:[%s5039_s1 + $0xf8] sm:$0xff]  ;;  %v3167_v33 = vcombine.low %v52_v20, %v56_v21  ;;  %v3169_v34 = vcombine.low %v53_v22, %v57_v23  ;;  %v116_v21 = vld [vmem:[%s5039_s1 + $0x290] sm:$0xff] }
  0xb0   :  { %v3178_v36 = vcombine.high %v61_v31, %v65_v32  ;;  %v120_v22 = vld [vmem:[%s5039_s1 + $0x2b0] sm:$0xff]  ;;  %v117_v23 = vld [vmem:[%s5039_s1 + $0x298] sm:$0xff] }
  0xb2   :  { %2519 = vmatpush1.bf16.msra.mxu0 %v3491_v39  ;;  %2648 = vmatpush1.bf16.msra.mxu1 %v3493_v40  ;;  %v69_v39 = vld [vmem:[%s5039_s1 + $0x118] sm:$0xff] }
  0xb3   :  { %2520 = vmatprep.subr.bf16.mxu0 %v3500_v41  ;;  %2649 = vmatprep.subr.bf16.mxu1 %v3502_v42  ;;  %v73_v40 = vld [vmem:[%s5039_s1 + $0x138] sm:$0xff]  ;;  %v3175_v41 = vcombine.low %v60_v28, %v64_v29  ;;  %v3177_v42 = vcombine.low %v61_v31, %v65_v32  ;;  %v124_v29 = vld [vmem:[%s5039_s1 + $0x2d0] sm:$0xff] }
  0xb4   :  { %v3186_v44 = vcombine.high %v69_v39, %v73_v40  ;;  %v125_v31 = vld [vmem:[%s5039_s1 + $0x2d8] sm:$0xff] }
  0xb5   :  { %v129_v32 = vld [vmem:[%s5039_s1 + $0x2f8] sm:$0xff] }
  0xb6   :  { %2521 = vmatpush1.bf16.msra.mxu0 %v3499_v47  ;;  %2650 = vmatpush1.bf16.msra.mxu1 %v3501_v48  ;;  %v77_v47 = vld [vmem:[%s5039_s1 + $0x158] sm:$0xff] }
  0xb7   :  { %2522 = vmatprep.subr.bf16.mxu0 %v3508_v49  ;;  %2651 = vmatprep.subr.bf16.mxu1 %v3510_v50  ;;  %v81_v48 = vld [vmem:[%s5039_s1 + $0x178] sm:$0xff]  ;;  %v3183_v49 = vcombine.low %v68_v37, %v72_v38  ;;  %v3185_v50 = vcombine.low %v69_v39, %v73_v40  ;;  %v132_v37 = vld [vmem:[%s5039_s1 + $0x310] sm:$0xff] }
  0xb8   :  { %v3194_v52 = vcombine.high %v77_v47, %v81_v48  ;;  %v136_v38 = vld [vmem:[%s5039_s1 + $0x330] sm:$0xff]  ;;  %v133_v39 = vld [vmem:[%s5039_s1 + $0x318] sm:$0xff] }
  0xb9   :  { %v137_v40 = vld [vmem:[%s5039_s1 + $0x338] sm:$0xff] }
  0xba   :  { %2523 = vmatpush1.bf16.msra.mxu0 %v3507_v55  ;;  %2652 = vmatpush1.bf16.msra.mxu1 %v3509_v56  ;;  %v85_v55 = vld [vmem:[%s5039_s1 + $0x198] sm:$0xff] }
  0xbb   :  { %2524 = vmatprep.subr.bf16.mxu0 %v3516_v57  ;;  %2653 = vmatprep.subr.bf16.mxu1 %v3518_v58  ;;  %v89_v56 = vld [vmem:[%s5039_s1 + $0x1b8] sm:$0xff]  ;;  %v3191_v57 = vcombine.low %v76_v45, %v80_v46  ;;  %v3193_v58 = vcombine.low %v77_v47, %v81_v48  ;;  %v140_v45 = vld [vmem:[%s5039_s1 + $0x350] sm:$0xff] }
  0xbc   :  { %v3202_v60 = vcombine.high %v85_v55, %v89_v56  ;;  %v144_v46 = vld [vmem:[%s5039_s1 + $0x370] sm:$0xff]  ;;  %v141_v47 = vld [vmem:[%s5039_s1 + $0x358] sm:$0xff] }
  0xbd   :  { %v145_v48 = vld [vmem:[%s5039_s1 + $0x378] sm:$0xff] }
  0xbe   :  { %2525 = vmatpush1.bf16.msra.mxu0 %v3515_v63  ;;  %2654 = vmatpush1.bf16.msra.mxu1 %v3517_v0  ;;  %v93_v63 = vld [vmem:[%s5039_s1 + $0x1d8] sm:$0xff] }
  0xbf   :  { %2526 = vmatprep.subr.bf16.mxu0 %v3524_v1  ;;  %2655 = vmatprep.subr.bf16.mxu1 %v3526_v2  ;;  %v97_v0 = vld [vmem:[%s5039_s1 + $0x1f8] sm:$0xff]  ;;  %v3199_v1 = vcombine.low %v84_v53, %v88_v54  ;;  %v3201_v2 = vcombine.low %v85_v55, %v89_v56  ;;  %v148_v53 = vld [vmem:[%s5039_s1 + $0x390] sm:$0xff] }
  0xc0   :  { %v3210_v4 = vcombine.high %v93_v63, %v97_v0  ;;  %v152_v54 = vld [vmem:[%s5039_s1 + $0x3b0] sm:$0xff]  ;;  %v149_v55 = vld [vmem:[%s5039_s1 + $0x398] sm:$0xff] }
  0xc1   :  { %v153_v56 = vld [vmem:[%s5039_s1 + $0x3b8] sm:$0xff] }
  0xc2   :  { %2527 = vmatpush1.bf16.msra.mxu0 %v3523_v7  ;;  %2656 = vmatpush1.bf16.msra.mxu1 %v3525_v8  ;;  %v101_v7 = vld [vmem:[%s5039_s1 + $0x218] sm:$0xff] }
  0xc3   :  { %2668 = vmatprep.subr.bf16.mxu0 %v3152_v9  ;;  %2797 = vmatprep.subr.bf16.mxu1 %v3154_v10  ;;  %v105_v8 = vld [vmem:[%s5039_s1 + $0x238] sm:$0xff]  ;;  %v3207_v9 = vcombine.low %v92_v61, %v96_v62  ;;  %v3209_v10 = vcombine.low %v93_v63, %v97_v0  ;;  %v156_v61 = vld [vmem:[%s5039_s1 + $0x3d0] sm:$0xff] }
  0xc4   :  { %v3218_v12 = vcombine.high %v101_v7, %v105_v8  ;;  %v160_v62 = vld [vmem:[%s5039_s1 + $0x3f0] sm:$0xff]  ;;  %v157_v63 = vld [vmem:[%s5039_s1 + $0x3d8] sm:$0xff] }
  0xc5   :  { %2529 = vmatmul.mubr.bf16.vlgmr.msra.gmra.mrb[0].mxu0 %v3592_v13  ;;  %2658 = vmatmul.mubr.bf16.vlgmr.msra.gmra.mrb[0].mxu1 %v3592_v13  ;;  %v108_v13 = vld [vmem:[%s5039_s1 + $0x250] sm:$0xff]  ;;  %v161_v0 = vld [vmem:[%s5039_s1 + $0x3f8] sm:$0xff] }
  0xc6   :  { %2669 = vmatpush1.bf16.msra.mxu0 %v3151_v16  ;;  %2798 = vmatpush1.bf16.msra.mxu1 %v3153_v17  ;;  %v113_v16 = vld [vmem:[%s5039_s1 + $0x278] sm:$0xff]  ;;  %v3215_v17 = vcombine.low %v100_v5, %v104_v6  ;;  %v164_v5 = vld [vmem:[%s5039_s1 + $0x410] sm:$0xff] }
  0xc7   :  { %2670 = vmatprep.subr.bf16.mxu0 %v3160_v18  ;;  %2799 = vmatprep.subr.bf16.mxu1 %v3162_v19  ;;  %v3217_v18 = vcombine.low %v101_v7, %v105_v8  ;;  %v3224_v19 = vcombine.high %v108_v13, %v112_v14  ;;  %v3226_v20 = vcombine.high %v109_v15, %v113_v16  ;;  %v168_v6 = vld [vmem:[%s5039_s1 + $0x430] sm:$0xff]  ;;  %v165_v7 = vld [vmem:[%s5039_s1 + $0x418] sm:$0xff] }
  0xc8   :  { %2700 = vmatprep.mubr.bf16.mxu0 %v3633_v30  ;;  %2829 = vmatprep.mubr.bf16.mxu1 %v3633_v30  ;;  %v128_v30 = vld [vmem:[%s5039_s1 + $0x2f0] sm:$0xff]  ;;  %v169_v8 = vld [vmem:[%s5039_s1 + $0x438] sm:$0xff] }
  0xca   :  { %2671 = vmatpush1.bf16.msra.mxu0 %v3159_v24  ;;  %2800 = vmatpush1.bf16.msra.mxu1 %v3161_v25  ;;  %v121_v24 = vld [vmem:[%s5039_s1 + $0x2b8] sm:$0xff]  ;;  %v3223_v25 = vcombine.low %v108_v13, %v112_v14  ;;  %v172_v13 = vld [vmem:[%s5039_s1 + $0x450] sm:$0xff] }
  0xcb   :  { %2672 = vmatprep.subr.bf16.mxu0 %v3168_v26  ;;  %2801 = vmatprep.subr.bf16.mxu1 %v3170_v27  ;;  %v3225_v26 = vcombine.low %v109_v15, %v113_v16  ;;  %v3232_v27 = vcombine.high %v116_v21, %v120_v22  ;;  %v3234_v28 = vcombine.high %v117_v23, %v121_v24  ;;  %v176_v14 = vld [vmem:[%s5039_s1 + $0x470] sm:$0xff]  ;;  %v173_v15 = vld [vmem:[%s5039_s1 + $0x458] sm:$0xff] }
  0xcc   :  { %v177_v16 = vld [vmem:[%s5039_s1 + $0x478] sm:$0xff] }
  0xce   :  { %2673 = vmatpush1.bf16.msra.mxu0 %v3167_v33  ;;  %2802 = vmatpush1.bf16.msra.mxu1 %v3169_v34  ;;  %v3231_v33 = vcombine.low %v116_v21, %v120_v22  ;;  %v3233_v34 = vcombine.low %v117_v23, %v121_v24  ;;  %v180_v21 = vld [vmem:[%s5039_s1 + $0x490] sm:$0xff]  ;;  %v3634_v23 = vld [vmem:[%s5040_s0] ss:$24 sps:$4 sm:$0xff]  }
  0xcf   :  { %2674 = vmatprep.subr.bf16.mxu0 %v3176_v35  ;;  %2803 = vmatprep.subr.bf16.mxu1 %v3178_v36  ;;  %v3240_v35 = vcombine.high %v124_v29, %v128_v30  ;;  %v3242_v36 = vcombine.high %v125_v31, %v129_v32  ;;  %v184_v22 = vld [vmem:[%s5039_s1 + $0x4b0] sm:$0xff]  ;;  %v181_v24 = vld [vmem:[%s5039_s1 + $0x498] sm:$0xff] }
  0xd2   :  { %2675 = vmatpush1.bf16.msra.mxu0 %v3175_v41  ;;  %2804 = vmatpush1.bf16.msra.mxu1 %v3177_v42  ;;  %v3239_v41 = vcombine.low %v124_v29, %v128_v30  ;;  %v3241_v42 = vcombine.low %v125_v31, %v129_v32  ;;  %v188_v30 = vld [vmem:[%s5039_s1 + $0x4d0] sm:$0xff]  ;;  %v3635_v32 = vld [vmem:[%s5040_s0 + $0xc] ss:$24 sps:$4 sm:$0xff]  }
  0xd3   :  { %2676 = vmatprep.subr.bf16.mxu0 %v3184_v43  ;;  %2805 = vmatprep.subr.bf16.mxu1 %v3186_v44  ;;  %v3248_v43 = vcombine.high %v132_v37, %v136_v38  ;;  %v3250_v44 = vcombine.high %v133_v39, %v137_v40  ;;  %v192_v31 = vld [vmem:[%s5039_s1 + $0x4f0] sm:$0xff] }
  0xd6   :  { %2677 = vmatpush1.bf16.msra.mxu0 %v3183_v49  ;;  %2806 = vmatpush1.bf16.msra.mxu1 %v3185_v50  ;;  %v3247_v49 = vcombine.low %v132_v37, %v136_v38  ;;  %v3249_v50 = vcombine.low %v133_v39, %v137_v40  ;;  %v3304_v37 = vcombine.high %v188_v30, %v192_v31  ;;  %v196_v39 = vld [vmem:[%s5039_s1 + $0x510] sm:$0xff] }
  0xd7   :  { %2678 = vmatprep.subr.bf16.mxu0 %v3192_v51  ;;  %2807 = vmatprep.subr.bf16.mxu1 %v3194_v52  ;;  %v3256_v51 = vcombine.high %v140_v45, %v144_v46  ;;  %v3258_v52 = vcombine.high %v141_v47, %v145_v48  ;;  %v200_v40 = vld [vmem:[%s5039_s1 + $0x530] sm:$0xff] }
  0xda   :  { %2679 = vmatpush1.bf16.msra.mxu0 %v3191_v57  ;;  %2808 = vmatpush1.bf16.msra.mxu1 %v3193_v58  ;;  %v3255_v57 = vcombine.low %v140_v45, %v144_v46  ;;  %v3257_v58 = vcombine.low %v141_v47, %v145_v48  ;;  %v3312_v45 = vcombine.high %v196_v39, %v200_v40  ;;  %v204_v47 = vld [vmem:[%s5039_s1 + $0x550] sm:$0xff] }
  0xdb   :  { %2680 = vmatprep.subr.bf16.mxu0 %v3200_v59  ;;  %2809 = vmatprep.subr.bf16.mxu1 %v3202_v60  ;;  %v3264_v59 = vcombine.high %v148_v53, %v152_v54  ;;  %v3266_v60 = vcombine.high %v149_v55, %v153_v56  ;;  %v208_v48 = vld [vmem:[%s5039_s1 + $0x570] sm:$0xff] }
  0xde   :  { %2681 = vmatpush1.bf16.msra.mxu0 %v3199_v1  ;;  %2810 = vmatpush1.bf16.msra.mxu1 %v3201_v2  ;;  %v3263_v1 = vcombine.low %v148_v53, %v152_v54  ;;  %v3265_v2 = vcombine.low %v149_v55, %v153_v56  ;;  %v3320_v53 = vcombine.high %v204_v47, %v208_v48  ;;  %v212_v55 = vld [vmem:[%s5039_s1 + $0x590] sm:$0xff] }
  0xdf   :  { %2682 = vmatprep.subr.bf16.mxu0 %v3208_v3  ;;  %2811 = vmatprep.subr.bf16.mxu1 %v3210_v4  ;;  %v3272_v3 = vcombine.high %v156_v61, %v160_v62  ;;  %v3274_v4 = vcombine.high %v157_v63, %v161_v0  ;;  %v216_v56 = vld [vmem:[%s5039_s1 + $0x5b0] sm:$0xff] }
  0xe2   :  { %2683 = vmatpush1.bf16.msra.mxu0 %v3207_v9  ;;  %2812 = vmatpush1.bf16.msra.mxu1 %v3209_v10  ;;  %v3271_v9 = vcombine.low %v156_v61, %v160_v62  ;;  %v3273_v10 = vcombine.low %v157_v63, %v161_v0  ;;  %v3328_v61 = vcombine.high %v212_v55, %v216_v56  ;;  %v220_v63 = vld [vmem:[%s5039_s1 + $0x5d0] sm:$0xff] }
  0xe3   :  { %2684 = vmatprep.subr.bf16.mxu0 %v3216_v11  ;;  %2813 = vmatprep.subr.bf16.mxu1 %v3218_v12  ;;  %v3280_v11 = vcombine.high %v164_v5, %v168_v6  ;;  %v3282_v12 = vcombine.high %v165_v7, %v169_v8  ;;  %v224_v0 = vld [vmem:[%s5039_s1 + $0x5f0] sm:$0xff] }
  0xe6   :  { %2685 = vmatpush1.bf16.msra.mxu0 %v3215_v17  ;;  %2814 = vmatpush1.bf16.msra.mxu1 %v3217_v18  ;;  %v3279_v17 = vcombine.low %v164_v5, %v168_v6  ;;  %v3281_v18 = vcombine.low %v165_v7, %v169_v8  ;;  %v3336_v5 = vcombine.high %v220_v63, %v224_v0  ;;  %v228_v7 = vld [vmem:[%s5039_s1 + $0x610] sm:$0xff] }
  0xe7   :  { %2686 = vmatprep.subr.bf16.mxu0 %v3224_v19  ;;  %2815 = vmatprep.subr.bf16.mxu1 %v3226_v20  ;;  %v3288_v19 = vcombine.high %v172_v13, %v176_v14  ;;  %v3290_v20 = vcombine.high %v173_v15, %v177_v16  ;;  %v232_v8 = vld [vmem:[%s5039_s1 + $0x630] sm:$0xff] }
  0xea   :  { %2687 = vmatpush1.bf16.msra.mxu0 %v3223_v25  ;;  %2816 = vmatpush1.bf16.msra.mxu1 %v3225_v26  ;;  %v185_v25 = vld [vmem:[%s5039_s1 + $0x4b8] sm:$0xff]  ;;  %v3287_v26 = vcombine.low %v172_v13, %v176_v14  ;;  %v3344_v13 = vcombine.high %v228_v7, %v232_v8 }
  0xeb   :  { %2688 = vmatprep.subr.bf16.mxu0 %v3232_v27  ;;  %2817 = vmatprep.subr.bf16.mxu1 %v3234_v28  ;;  %v3289_v27 = vcombine.low %v173_v15, %v177_v16  ;;  %v3296_v28 = vcombine.high %v180_v21, %v184_v22  ;;  %v3298_v29 = vcombine.high %v181_v24, %v185_v25  ;;  %v236_v15 = vld [vmem:[%s5039_s1 + $0x650] sm:$0xff] }
  0xec   :  { %v240_v16 = vld [vmem:[%s5039_s1 + $0x670] sm:$0xff] }
  0xee   :  { %2689 = vmatpush1.bf16.msra.mxu0 %v3231_v33  ;;  %2818 = vmatpush1.bf16.msra.mxu1 %v3233_v34  ;;  %v189_v33 = vld [vmem:[%s5039_s1 + $0x4d8] sm:$0xff] }
  0xef   :  { %2690 = vmatprep.subr.bf16.mxu0 %v3240_v35  ;;  %2819 = vmatprep.subr.bf16.mxu1 %v3242_v36  ;;  %v193_v34 = vld [vmem:[%s5039_s1 + $0x4f8] sm:$0xff]  ;;  %v3295_v35 = vcombine.low %v180_v21, %v184_v22  ;;  %v3297_v36 = vcombine.low %v181_v24, %v185_v25  ;;  %v3352_v21 = vcombine.high %v236_v15, %v240_v16  ;;  %v248_v24 = vld [vmem:[%s5039_s1 + $0x6b0] sm:$0xff] }
  0xf0   :  { %v3306_v38 = vcombine.high %v189_v33, %v193_v34  ;;  %v245_v25 = vld [vmem:[%s5039_s1 + $0x698] sm:$0xff] }
  0xf2   :  { %2691 = vmatpush1.bf16.msra.mxu0 %v3239_v41  ;;  %2820 = vmatpush1.bf16.msra.mxu1 %v3241_v42  ;;  %v197_v41 = vld [vmem:[%s5039_s1 + $0x518] sm:$0xff] }
  0xf3   :  { %2692 = vmatprep.subr.bf16.mxu0 %v3248_v43  ;;  %2821 = vmatprep.subr.bf16.mxu1 %v3250_v44  ;;  %v201_v42 = vld [vmem:[%s5039_s1 + $0x538] sm:$0xff]  ;;  %v3303_v43 = vcombine.low %v188_v30, %v192_v31  ;;  %v3305_v44 = vcombine.low %v189_v33, %v193_v34  ;;  %v252_v31 = vld [vmem:[%s5039_s1 + $0x6d0] sm:$0xff] }
  0xf4   :  { %v3314_v46 = vcombine.high %v197_v41, %v201_v42  ;;  %v253_v33 = vld [vmem:[%s5039_s1 + $0x6d8] sm:$0xff] }
  0xf5   :  { %v257_v34 = vld [vmem:[%s5039_s1 + $0x6f8] sm:$0xff] }
  0xf6   :  { %2693 = vmatpush1.bf16.msra.mxu0 %v3247_v49  ;;  %2822 = vmatpush1.bf16.msra.mxu1 %v3249_v50  ;;  %v205_v49 = vld [vmem:[%s5039_s1 + $0x558] sm:$0xff] }
  0xf7   :  { %2694 = vmatprep.subr.bf16.mxu0 %v3256_v51  ;;  %2823 = vmatprep.subr.bf16.mxu1 %v3258_v52  ;;  %v209_v50 = vld [vmem:[%s5039_s1 + $0x578] sm:$0xff]  ;;  %v3311_v51 = vcombine.low %v196_v39, %v200_v40  ;;  %v3313_v52 = vcombine.low %v197_v41, %v201_v42  ;;  %v260_v39 = vld [vmem:[%s5039_s1 + $0x710] sm:$0xff] }
  0xf8   :  { %v3322_v54 = vcombine.high %v205_v49, %v209_v50  ;;  %v264_v40 = vld [vmem:[%s5039_s1 + $0x730] sm:$0xff]  ;;  %v261_v41 = vld [vmem:[%s5039_s1 + $0x718] sm:$0xff] }
  0xf9   :  { %v265_v42 = vld [vmem:[%s5039_s1 + $0x738] sm:$0xff] }
  0xfa   :  { %2695 = vmatpush1.bf16.msra.mxu0 %v3255_v57  ;;  %2824 = vmatpush1.bf16.msra.mxu1 %v3257_v58  ;;  %v213_v57 = vld [vmem:[%s5039_s1 + $0x598] sm:$0xff] }
  0xfb   :  { %2696 = vmatprep.subr.bf16.mxu0 %v3264_v59  ;;  %2825 = vmatprep.subr.bf16.mxu1 %v3266_v60  ;;  %v217_v58 = vld [vmem:[%s5039_s1 + $0x5b8] sm:$0xff]  ;;  %v3319_v59 = vcombine.low %v204_v47, %v208_v48  ;;  %v3321_v60 = vcombine.low %v205_v49, %v209_v50  ;;  %v268_v47 = vld [vmem:[%s5039_s1 + $0x750] sm:$0xff] }
  0xfc   :  { %v3330_v62 = vcombine.high %v213_v57, %v217_v58  ;;  %v272_v48 = vld [vmem:[%s5039_s1 + $0x770] sm:$0xff]  ;;  %v269_v49 = vld [vmem:[%s5039_s1 + $0x758] sm:$0xff] }
  0xfd   :  { %v273_v50 = vld [vmem:[%s5039_s1 + $0x778] sm:$0xff] }
  0xfe   :  { %2697 = vmatpush1.bf16.msra.mxu0 %v3263_v1  ;;  %2826 = vmatpush1.bf16.msra.mxu1 %v3265_v2  ;;  %v221_v1 = vld [vmem:[%s5039_s1 + $0x5d8] sm:$0xff] }
  0xff   :  { %2698 = vmatprep.subr.bf16.mxu0 %v3272_v3  ;;  %2827 = vmatprep.subr.bf16.mxu1 %v3274_v4  ;;  %v225_v2 = vld [vmem:[%s5039_s1 + $0x5f8] sm:$0xff]  ;;  %v3327_v3 = vcombine.low %v212_v55, %v216_v56  ;;  %v3329_v4 = vcombine.low %v213_v57, %v217_v58  ;;  %v276_v55 = vld [vmem:[%s5039_s1 + $0x790] sm:$0xff] }
 0x100   :  { %v3338_v6 = vcombine.high %v221_v1, %v225_v2  ;;  %v280_v56 = vld [vmem:[%s5039_s1 + $0x7b0] sm:$0xff]  ;;  %v277_v57 = vld [vmem:[%s5039_s1 + $0x798] sm:$0xff] }
 0x101   :  { %v281_v58 = vld [vmem:[%s5039_s1 + $0x7b8] sm:$0xff] }
 0x102   :  { %2699 = vmatpush1.bf16.msra.mxu0 %v3271_v9  ;;  %2828 = vmatpush1.bf16.msra.mxu1 %v3273_v10  ;;  %v229_v9 = vld [vmem:[%s5039_s1 + $0x618] sm:$0xff] }
 0x103   :  { %2711 = vmatprep.subr.bf16.mxu0 %v3280_v11  ;;  %2840 = vmatprep.subr.bf16.mxu1 %v3282_v12  ;;  %v233_v10 = vld [vmem:[%s5039_s1 + $0x638] sm:$0xff]  ;;  %v3335_v11 = vcombine.low %v220_v63, %v224_v0  ;;  %v3337_v12 = vcombine.low %v221_v1, %v225_v2  ;;  %v284_v63 = vld [vmem:[%s5039_s1 + $0x7d0] sm:$0xff] }
 0x104   :  { %v3346_v14 = vcombine.high %v229_v9, %v233_v10  ;;  %v288_v0 = vld [vmem:[%s5039_s1 + $0x7f0] sm:$0xff]  ;;  %v285_v1 = vld [vmem:[%s5039_s1 + $0x7d8] sm:$0xff] }
 0x105   :  { %2701 = vmatmul.mubr.bf16.vlgmr.msra.gmra.mrb[4].mxu0 %v3634_v23  ;;  %2830 = vmatmul.mubr.bf16.vlgmr.msra.gmra.mrb[4].mxu1 %v3634_v23  ;;  %v244_v23 = vld [vmem:[%s5039_s1 + $0x690] sm:$0xff]  ;;  %v289_v2 = vld [vmem:[%s5039_s1 + $0x7f8] sm:$0xff] }
 0x106   :  { %2712 = vmatpush1.bf16.msra.mxu0 %v3279_v17  ;;  %2841 = vmatpush1.bf16.msra.mxu1 %v3281_v18  ;;  %v237_v17 = vld [vmem:[%s5039_s1 + $0x658] sm:$0xff] }
 0x107   :  { %2713 = vmatprep.subr.bf16.mxu0 %v3288_v19  ;;  %2842 = vmatprep.subr.bf16.mxu1 %v3290_v20  ;;  %v241_v18 = vld [vmem:[%s5039_s1 + $0x678] sm:$0xff]  ;;  %v3343_v19 = vcombine.low %v228_v7, %v232_v8  ;;  %v3345_v20 = vcombine.low %v229_v9, %v233_v10  ;;  %v292_v7 = vld [vmem:[%s5039_s1 + $0x810] sm:$0xff] }
 0x108   :  { %2743 = vmatprep.mubr.bf16.mxu0 %v3635_v32  ;;  %2872 = vmatprep.mubr.bf16.mxu1 %v3635_v32  ;;  %v3354_v22 = vcombine.high %v237_v17, %v241_v18  ;;  %v256_v32 = vld [vmem:[%s5039_s1 + $0x6f0] sm:$0xff]  ;;  %v293_v9 = vld [vmem:[%s5039_s1 + $0x818] sm:$0xff] }
 0x109   :  { %v296_v8 = vld [vmem:[%s5039_s1 + $0x830] sm:$0xff]  ;;  %v297_v10 = vld [vmem:[%s5039_s1 + $0x838] sm:$0xff] }
 0x10a   :  { %2714 = vmatpush1.bf16.msra.mxu0 %v3287_v26  ;;  %2843 = vmatpush1.bf16.msra.mxu1 %v3289_v27  ;;  %v249_v26 = vld [vmem:[%s5039_s1 + $0x6b8] sm:$0xff]  ;;  %v3351_v27 = vcombine.low %v236_v15, %v240_v16  ;;  %v300_v15 = vld [vmem:[%s5039_s1 + $0x850] sm:$0xff] }
 0x10b   :  { %2715 = vmatprep.subr.bf16.mxu0 %v3296_v28  ;;  %2844 = vmatprep.subr.bf16.mxu1 %v3298_v29  ;;  %v3353_v28 = vcombine.low %v237_v17, %v241_v18  ;;  %v3360_v29 = vcombine.high %v244_v23, %v248_v24  ;;  %v3362_v30 = vcombine.high %v245_v25, %v249_v26  ;;  %v304_v16 = vld [vmem:[%s5039_s1 + $0x870] sm:$0xff]  ;;  %v301_v17 = vld [vmem:[%s5039_s1 + $0x858] sm:$0xff] }
 0x10c   :  { %v305_v18 = vld [vmem:[%s5039_s1 + $0x878] sm:$0xff] }
 0x10e   :  { %2716 = vmatpush1.bf16.msra.mxu0 %v3295_v35  ;;  %2845 = vmatpush1.bf16.msra.mxu1 %v3297_v36  ;;  %v3359_v35 = vcombine.low %v244_v23, %v248_v24  ;;  %v3361_v36 = vcombine.low %v245_v25, %v249_v26  ;;  %v308_v23 = vld [vmem:[%s5039_s1 + $0x890] sm:$0xff]  ;;  %v3636_v25 = vld [vmem:[%s5040_s0 + $0x8] ss:$24 sps:$4 sm:$0xff]   ;;  %v309_v26 = vld [vmem:[%s5039_s1 + $0x898] sm:$0xff] }
 0x10f   :  { %2717 = vmatprep.subr.bf16.mxu0 %v3304_v37  ;;  %2846 = vmatprep.subr.bf16.mxu1 %v3306_v38  ;;  %v3368_v37 = vcombine.high %v252_v31, %v256_v32  ;;  %v3370_v38 = vcombine.high %v253_v33, %v257_v34  ;;  %v312_v24 = vld [vmem:[%s5039_s1 + $0x8b0] sm:$0xff] }
 0x112   :  { %2718 = vmatpush1.bf16.msra.mxu0 %v3303_v43  ;;  %2847 = vmatpush1.bf16.msra.mxu1 %v3305_v44  ;;  %v3367_v43 = vcombine.low %v252_v31, %v256_v32  ;;  %v3369_v44 = vcombine.low %v253_v33, %v257_v34  ;;  %v316_v32 = vld [vmem:[%s5039_s1 + $0x8d0] sm:$0xff] }
 0x113   :  { %2719 = vmatprep.subr.bf16.mxu0 %v3312_v45  ;;  %2848 = vmatprep.subr.bf16.mxu1 %v3314_v46  ;;  %v3376_v45 = vcombine.high %v260_v39, %v264_v40  ;;  %v3378_v46 = vcombine.high %v261_v41, %v265_v42  ;;  %v320_v33 = vld [vmem:[%s5039_s1 + $0x8f0] sm:$0xff] }
 0x114   :  { %v3637_v34 = vld [vmem:[%s5040_s0 + $0x14] ss:$24 sps:$4 sm:$0xff]  }
 0x116   :  { %2720 = vmatpush1.bf16.msra.mxu0 %v3311_v51  ;;  %2849 = vmatpush1.bf16.msra.mxu1 %v3313_v52  ;;  %v3375_v51 = vcombine.low %v260_v39, %v264_v40  ;;  %v3377_v52 = vcombine.low %v261_v41, %v265_v42  ;;  %v3432_v39 = vcombine.high %v316_v32, %v320_v33  ;;  %v324_v41 = vld [vmem:[%s5039_s1 + $0x910] sm:$0xff] }
 0x117   :  { %2721 = vmatprep.subr.bf16.mxu0 %v3320_v53  ;;  %2850 = vmatprep.subr.bf16.mxu1 %v3322_v54  ;;  %v3384_v53 = vcombine.high %v268_v47, %v272_v48  ;;  %v3386_v54 = vcombine.high %v269_v49, %v273_v50  ;;  %v328_v42 = vld [vmem:[%s5039_s1 + $0x930] sm:$0xff] }
 0x11a   :  { %2722 = vmatpush1.bf16.msra.mxu0 %v3319_v59  ;;  %2851 = vmatpush1.bf16.msra.mxu1 %v3321_v60  ;;  %v3383_v59 = vcombine.low %v268_v47, %v272_v48  ;;  %v3385_v60 = vcombine.low %v269_v49, %v273_v50  ;;  %v3440_v47 = vcombine.high %v324_v41, %v328_v42  ;;  %v332_v49 = vld [vmem:[%s5039_s1 + $0x950] sm:$0xff] }
 0x11b   :  { %2723 = vmatprep.subr.bf16.mxu0 %v3328_v61  ;;  %2852 = vmatprep.subr.bf16.mxu1 %v3330_v62  ;;  %v3392_v61 = vcombine.high %v276_v55, %v280_v56  ;;  %v3394_v62 = vcombine.high %v277_v57, %v281_v58  ;;  %v336_v50 = vld [vmem:[%s5039_s1 + $0x970] sm:$0xff] }
 0x11e   :  { %2724 = vmatpush1.bf16.msra.mxu0 %v3327_v3  ;;  %2853 = vmatpush1.bf16.msra.mxu1 %v3329_v4  ;;  %v3391_v3 = vcombine.low %v276_v55, %v280_v56  ;;  %v3393_v4 = vcombine.low %v277_v57, %v281_v58  ;;  %v3448_v55 = vcombine.high %v332_v49, %v336_v50  ;;  %v340_v57 = vld [vmem:[%s5039_s1 + $0x990] sm:$0xff] }
 0x11f   :  { %2725 = vmatprep.subr.bf16.mxu0 %v3336_v5  ;;  %2854 = vmatprep.subr.bf16.mxu1 %v3338_v6  ;;  %v3400_v5 = vcombine.high %v284_v63, %v288_v0  ;;  %v3402_v6 = vcombine.high %v285_v1, %v289_v2  ;;  %v344_v58 = vld [vmem:[%s5039_s1 + $0x9b0] sm:$0xff] }
 0x122   :  { %2726 = vmatpush1.bf16.msra.mxu0 %v3335_v11  ;;  %2855 = vmatpush1.bf16.msra.mxu1 %v3337_v12  ;;  %v3399_v11 = vcombine.low %v284_v63, %v288_v0  ;;  %v3401_v12 = vcombine.low %v285_v1, %v289_v2  ;;  %v3456_v63 = vcombine.high %v340_v57, %v344_v58  ;;  %v348_v1 = vld [vmem:[%s5039_s1 + $0x9d0] sm:$0xff] }
 0x123   :  { %2727 = vmatprep.subr.bf16.mxu0 %v3344_v13  ;;  %2856 = vmatprep.subr.bf16.mxu1 %v3346_v14  ;;  %v3408_v13 = vcombine.high %v292_v7, %v296_v8  ;;  %v3410_v14 = vcombine.high %v293_v9, %v297_v10  ;;  %v352_v2 = vld [vmem:[%s5039_s1 + $0x9f0] sm:$0xff] }
 0x126   :  { %2728 = vmatpush1.bf16.msra.mxu0 %v3343_v19  ;;  %2857 = vmatpush1.bf16.msra.mxu1 %v3345_v20  ;;  %v3407_v19 = vcombine.low %v292_v7, %v296_v8  ;;  %v3409_v20 = vcombine.low %v293_v9, %v297_v10  ;;  %v3464_v7 = vcombine.high %v348_v1, %v352_v2  ;;  %v356_v9 = vld [vmem:[%s5039_s1 + $0xa10] sm:$0xff] }
 0x127   :  { %2729 = vmatprep.subr.bf16.mxu0 %v3352_v21  ;;  %2858 = vmatprep.subr.bf16.mxu1 %v3354_v22  ;;  %v3416_v21 = vcombine.high %v300_v15, %v304_v16  ;;  %v3418_v22 = vcombine.high %v301_v17, %v305_v18  ;;  %v360_v10 = vld [vmem:[%s5039_s1 + $0xa30] sm:$0xff] }
 0x12a   :  { %2730 = vmatpush1.bf16.msra.mxu0 %v3351_v27  ;;  %2859 = vmatpush1.bf16.msra.mxu1 %v3353_v28  ;;  %v313_v27 = vld [vmem:[%s5039_s1 + $0x8b8] sm:$0xff]  ;;  %v3415_v28 = vcombine.low %v300_v15, %v304_v16  ;;  %v3472_v15 = vcombine.high %v356_v9, %v360_v10 }
 0x12b   :  { %2731 = vmatprep.subr.bf16.mxu0 %v3360_v29  ;;  %2860 = vmatprep.subr.bf16.mxu1 %v3362_v30  ;;  %v3417_v29 = vcombine.low %v301_v17, %v305_v18  ;;  %v3424_v30 = vcombine.high %v308_v23, %v312_v24  ;;  %v3426_v31 = vcombine.high %v309_v26, %v313_v27  ;;  %v364_v17 = vld [vmem:[%s5039_s1 + $0xa50] sm:$0xff] }
 0x12c   :  { %v368_v18 = vld [vmem:[%s5039_s1 + $0xa70] sm:$0xff] }
 0x12e   :  { %2732 = vmatpush1.bf16.msra.mxu0 %v3359_v35  ;;  %2861 = vmatpush1.bf16.msra.mxu1 %v3361_v36  ;;  %v317_v35 = vld [vmem:[%s5039_s1 + $0x8d8] sm:$0xff] }
 0x12f   :  { %2733 = vmatprep.subr.bf16.mxu0 %v3368_v37  ;;  %2862 = vmatprep.subr.bf16.mxu1 %v3370_v38  ;;  %v321_v36 = vld [vmem:[%s5039_s1 + $0x8f8] sm:$0xff]  ;;  %v3423_v37 = vcombine.low %v308_v23, %v312_v24  ;;  %v3425_v38 = vcombine.low %v309_v26, %v313_v27  ;;  %v3480_v23 = vcombine.high %v364_v17, %v368_v18  ;;  %v376_v26 = vld [vmem:[%s5039_s1 + $0xab0] sm:$0xff] }
 0x130   :  { %v3434_v40 = vcombine.high %v317_v35, %v321_v36  ;;  %v373_v27 = vld [vmem:[%s5039_s1 + $0xa98] sm:$0xff] }
 0x132   :  { %2734 = vmatpush1.bf16.msra.mxu0 %v3367_v43  ;;  %2863 = vmatpush1.bf16.msra.mxu1 %v3369_v44  ;;  %v325_v43 = vld [vmem:[%s5039_s1 + $0x918] sm:$0xff] }
 0x133   :  { %2735 = vmatprep.subr.bf16.mxu0 %v3376_v45  ;;  %2864 = vmatprep.subr.bf16.mxu1 %v3378_v46  ;;  %v329_v44 = vld [vmem:[%s5039_s1 + $0x938] sm:$0xff]  ;;  %v3431_v45 = vcombine.low %v316_v32, %v320_v33  ;;  %v3433_v46 = vcombine.low %v317_v35, %v321_v36  ;;  %v380_v33 = vld [vmem:[%s5039_s1 + $0xad0] sm:$0xff] }
 0x134   :  { %v3442_v48 = vcombine.high %v325_v43, %v329_v44  ;;  %v381_v35 = vld [vmem:[%s5039_s1 + $0xad8] sm:$0xff] }
 0x135   :  { %v385_v36 = vld [vmem:[%s5039_s1 + $0xaf8] sm:$0xff] }
 0x136   :  { %2736 = vmatpush1.bf16.msra.mxu0 %v3375_v51  ;;  %2865 = vmatpush1.bf16.msra.mxu1 %v3377_v52  ;;  %v333_v51 = vld [vmem:[%s5039_s1 + $0x958] sm:$0xff] }
 0x137   :  { %2737 = vmatprep.subr.bf16.mxu0 %v3384_v53  ;;  %2866 = vmatprep.subr.bf16.mxu1 %v3386_v54  ;;  %v337_v52 = vld [vmem:[%s5039_s1 + $0x978] sm:$0xff]  ;;  %v3439_v53 = vcombine.low %v324_v41, %v328_v42  ;;  %v3441_v54 = vcombine.low %v325_v43, %v329_v44  ;;  %v388_v41 = vld [vmem:[%s5039_s1 + $0xb10] sm:$0xff] }
 0x138   :  { %v3450_v56 = vcombine.high %v333_v51, %v337_v52  ;;  %v392_v42 = vld [vmem:[%s5039_s1 + $0xb30] sm:$0xff]  ;;  %v389_v43 = vld [vmem:[%s5039_s1 + $0xb18] sm:$0xff] }
 0x139   :  { %v393_v44 = vld [vmem:[%s5039_s1 + $0xb38] sm:$0xff] }
 0x13a   :  { %2738 = vmatpush1.bf16.msra.mxu0 %v3383_v59  ;;  %2867 = vmatpush1.bf16.msra.mxu1 %v3385_v60  ;;  %v341_v59 = vld [vmem:[%s5039_s1 + $0x998] sm:$0xff] }
 0x13b   :  { %2739 = vmatprep.subr.bf16.mxu0 %v3392_v61  ;;  %2868 = vmatprep.subr.bf16.mxu1 %v3394_v62  ;;  %v345_v60 = vld [vmem:[%s5039_s1 + $0x9b8] sm:$0xff]  ;;  %v3447_v61 = vcombine.low %v332_v49, %v336_v50  ;;  %v3449_v62 = vcombine.low %v333_v51, %v337_v52  ;;  %v396_v49 = vld [vmem:[%s5039_s1 + $0xb50] sm:$0xff] }
 0x13c   :  { %v3458_v0 = vcombine.high %v341_v59, %v345_v60  ;;  %v400_v50 = vld [vmem:[%s5039_s1 + $0xb70] sm:$0xff]  ;;  %v397_v51 = vld [vmem:[%s5039_s1 + $0xb58] sm:$0xff] }
 0x13d   :  { %v401_v52 = vld [vmem:[%s5039_s1 + $0xb78] sm:$0xff] }
 0x13e   :  { %2740 = vmatpush1.bf16.msra.mxu0 %v3391_v3  ;;  %2869 = vmatpush1.bf16.msra.mxu1 %v3393_v4  ;;  %v349_v3 = vld [vmem:[%s5039_s1 + $0x9d8] sm:$0xff] }
 0x13f   :  { %2741 = vmatprep.subr.bf16.mxu0 %v3400_v5  ;;  %2870 = vmatprep.subr.bf16.mxu1 %v3402_v6  ;;  %v353_v4 = vld [vmem:[%s5039_s1 + $0x9f8] sm:$0xff]  ;;  %v3455_v5 = vcombine.low %v340_v57, %v344_v58  ;;  %v3457_v6 = vcombine.low %v341_v59, %v345_v60  ;;  %v404_v57 = vld [vmem:[%s5039_s1 + $0xb90] sm:$0xff] }
 0x140   :  { %v3466_v8 = vcombine.high %v349_v3, %v353_v4  ;;  %v408_v58 = vld [vmem:[%s5039_s1 + $0xbb0] sm:$0xff]  ;;  %v405_v59 = vld [vmem:[%s5039_s1 + $0xb98] sm:$0xff] }
 0x141   :  { %v409_v60 = vld [vmem:[%s5039_s1 + $0xbb8] sm:$0xff] }
 0x142   :  { %2742 = vmatpush1.bf16.msra.mxu0 %v3399_v11  ;;  %2871 = vmatpush1.bf16.msra.mxu1 %v3401_v12  ;;  %v357_v11 = vld [vmem:[%s5039_s1 + $0xa18] sm:$0xff] }
 0x143   :  { %2754 = vmatprep.subr.bf16.mxu0 %v3408_v13  ;;  %2883 = vmatprep.subr.bf16.mxu1 %v3410_v14  ;;  %v361_v12 = vld [vmem:[%s5039_s1 + $0xa38] sm:$0xff]  ;;  %v3463_v13 = vcombine.low %v348_v1, %v352_v2  ;;  %v3465_v14 = vcombine.low %v349_v3, %v353_v4  ;;  %v412_v1 = vld [vmem:[%s5039_s1 + $0xbd0] sm:$0xff] }
 0x144   :  { %v3474_v16 = vcombine.high %v357_v11, %v361_v12  ;;  %v416_v2 = vld [vmem:[%s5039_s1 + $0xbf0] sm:$0xff]  ;;  %v413_v3 = vld [vmem:[%s5039_s1 + $0xbd8] sm:$0xff] }
 0x145   :  { %2744 = vmatmul.mubr.bf16.vlgmr.msra.gmra.mrb[4].mxu0 %v3636_v25  ;;  %2873 = vmatmul.mubr.bf16.vlgmr.msra.gmra.mrb[4].mxu1 %v3636_v25  ;;  %v372_v25 = vld [vmem:[%s5039_s1 + $0xa90] sm:$0xff]  ;;  %v417_v4 = vld [vmem:[%s5039_s1 + $0xbf8] sm:$0xff] }
 0x146   :  { %2755 = vmatpush1.bf16.msra.mxu0 %v3407_v19  ;;  %2884 = vmatpush1.bf16.msra.mxu1 %v3409_v20  ;;  %v365_v19 = vld [vmem:[%s5039_s1 + $0xa58] sm:$0xff] }
 0x147   :  { %2756 = vmatprep.subr.bf16.mxu0 %v3416_v21  ;;  %2885 = vmatprep.subr.bf16.mxu1 %v3418_v22  ;;  %v369_v20 = vld [vmem:[%s5039_s1 + $0xa78] sm:$0xff]  ;;  %v3471_v21 = vcombine.low %v356_v9, %v360_v10  ;;  %v3473_v22 = vcombine.low %v357_v11, %v361_v12  ;;  %v3527_v9 = vcombine.low %v412_v1, %v416_v2  ;;  %v3638_v11 = vld [vmem:[%s5040_s0 + $0x10] ss:$24 sps:$4 sm:$0xff]  }
 0x148   :  { %2786 = vmatprep.mubr.bf16.mxu0 %v3637_v34  ;;  %2915 = vmatprep.mubr.bf16.mxu1 %v3637_v34  ;;  %v3482_v24 = vcombine.high %v365_v19, %v369_v20  ;;  %v384_v34 = vld [vmem:[%s5039_s1 + $0xaf0] sm:$0xff]  ;;  %v3529_v10 = vcombine.low %v413_v3, %v417_v4 }
 0x14a   :  { %2757 = vmatpush1.bf16.msra.mxu0 %v3415_v28  ;;  %2886 = vmatpush1.bf16.msra.mxu1 %v3417_v29  ;;  %v377_v28 = vld [vmem:[%s5039_s1 + $0xab8] sm:$0xff]  ;;  %v3479_v29 = vcombine.low %v364_v17, %v368_v18 }
 0x14b   :  { %2758 = vmatprep.subr.bf16.mxu0 %v3424_v30  ;;  %2887 = vmatprep.subr.bf16.mxu1 %v3426_v31  ;;  %v3481_v30 = vcombine.low %v365_v19, %v369_v20  ;;  %v3488_v31 = vcombine.high %v372_v25, %v376_v26  ;;  %v3490_v32 = vcombine.high %v373_v27, %v377_v28  ;;  %v3639_v20 = vmov 0  }
 0x14c   :  { %3583 = vset.pattern.permute.xlu0 %v3639_v20  ;;  %3582 = vset.pattern.permute.xlu1 %v3639_v20 }
 0x14e   :  { %2759 = vmatpush1.bf16.msra.mxu0 %v3423_v37  ;;  %2888 = vmatpush1.bf16.msra.mxu1 %v3425_v38  ;;  %v3487_v37 = vcombine.low %v372_v25, %v376_v26  ;;  %v3489_v38 = vcombine.low %v373_v27, %v377_v28  ;;  %v418_v26 = vld [vmem:[%s5041_s2] sm:$0xff] }
 0x14f   :  { %2760 = vmatprep.subr.bf16.mxu0 %v3432_v39  ;;  %2889 = vmatprep.subr.bf16.mxu1 %v3434_v40  ;;  %v3496_v39 = vcombine.high %v380_v33, %v384_v34  ;;  %v3498_v40 = vcombine.high %v381_v35, %v385_v36 }
 0x152   :  { %2761 = vmatpush1.bf16.msra.mxu0 %v3431_v45  ;;  %2890 = vmatpush1.bf16.msra.mxu1 %v3433_v46  ;;  %v3495_v45 = vcombine.low %v380_v33, %v384_v34  ;;  %v3497_v46 = vcombine.low %v381_v35, %v385_v36 }
 0x153   :  { %2762 = vmatprep.subr.bf16.mxu0 %v3440_v47  ;;  %2891 = vmatprep.subr.bf16.mxu1 %v3442_v48  ;;  %v3504_v47 = vcombine.high %v388_v41, %v392_v42  ;;  %v3506_v48 = vcombine.high %v389_v43, %v393_v44 }
 0x156   :  { %2763 = vmatpush1.bf16.msra.mxu0 %v3439_v53  ;;  %2892 = vmatpush1.bf16.msra.mxu1 %v3441_v54  ;;  %v3503_v53 = vcombine.low %v388_v41, %v392_v42  ;;  %v3505_v54 = vcombine.low %v389_v43, %v393_v44 }
 0x157   :  { %2764 = vmatprep.subr.bf16.mxu0 %v3448_v55  ;;  %2893 = vmatprep.subr.bf16.mxu1 %v3450_v56  ;;  %v3512_v55 = vcombine.high %v396_v49, %v400_v50  ;;  %v3514_v56 = vcombine.high %v397_v51, %v401_v52 }
 0x15a   :  { %2765 = vmatpush1.bf16.msra.mxu0 %v3447_v61  ;;  %2894 = vmatpush1.bf16.msra.mxu1 %v3449_v62  ;;  %v3511_v61 = vcombine.low %v396_v49, %v400_v50  ;;  %v3513_v62 = vcombine.low %v397_v51, %v401_v52 }
 0x15b   :  { %2766 = vmatprep.subr.bf16.mxu0 %v3456_v63  ;;  %2895 = vmatprep.subr.bf16.mxu1 %v3458_v0  ;;  %v3520_v63 = vcombine.high %v404_v57, %v408_v58  ;;  %v3522_v0 = vcombine.high %v405_v59, %v409_v60 }
 0x15e   :  { %2767 = vmatpush1.bf16.msra.mxu0 %v3455_v5  ;;  %2896 = vmatpush1.bf16.msra.mxu1 %v3457_v6  ;;  %v3519_v5 = vcombine.low %v404_v57, %v408_v58  ;;  %v3521_v6 = vcombine.low %v405_v59, %v409_v60 }
 0x15f   :  { %2768 = vmatprep.subr.bf16.mxu0 %v3464_v7  ;;  %2897 = vmatprep.subr.bf16.mxu1 %v3466_v8  ;;  %v3528_v7 = vcombine.high %v412_v1, %v416_v2  ;;  %v3530_v8 = vcombine.high %v413_v3, %v417_v4 }
 0x162   :  { %2769 = vmatpush1.bf16.msra.mxu0 %v3463_v13  ;;  %2898 = vmatpush1.bf16.msra.mxu1 %v3465_v14 }
 0x163   :  { %2770 = vmatprep.subr.bf16.mxu0 %v3472_v15  ;;  %2899 = vmatprep.subr.bf16.mxu1 %v3474_v16 }
 0x166   :  { %2771 = vmatpush1.bf16.msra.mxu0 %v3471_v21  ;;  %2900 = vmatpush1.bf16.msra.mxu1 %v3473_v22  ;;  %v3640_v21 = vmov -1e+30   ;;  %v420_v22 = vlaneseq }
 0x167   :  { %2772 = vmatprep.subr.bf16.mxu0 %v3480_v23  ;;  %2901 = vmatprep.subr.bf16.mxu1 %v3482_v24  ;;  %22 = vst.msk [vmem:[#allocation2] sm:$0xff] %vm21_vm0, %v3640_v21  ;;  %23 = vst.msk [vmem:[#allocation2 + $0x8] sm:$0xff] %vm21_vm0, %v3640_v21 }
 0x168   :  { %v421_v23 = vshrl.u32 %v420_v22, 7 }
 0x16a   :  { %2773 = vmatpush1.bf16.msra.mxu0 %v3479_v29  ;;  %2902 = vmatpush1.bf16.msra.mxu1 %v3481_v30  ;;  %v422_v24 = vsub.s32 0, %v421_v23  ;;  %v430_v25 = vsub.s32 2, %v421_v23  ;;  %v426_v27 = vsub.s32 1, %v421_v23  ;;  %v434_v28 = vsub.s32 3, %v421_v23 }
 0x16b   :  { %2774 = vmatprep.subr.bf16.mxu0 %v3488_v31  ;;  %2903 = vmatprep.subr.bf16.mxu1 %v3490_v32  ;;  %v438_v31 = vsub.s32 4, %v421_v23  ;;  %v442_v34 = vsub.s32 5, %v421_v23  ;;  %v446_v35 = vsub.s32 6, %v421_v23  ;;  %v450_v36 = vsub.s32 7, %v421_v23 }
 0x16c   :  { %v423_v29 = vrot.slane %v418_v26, %v422_v24  ;;  %v431_v30 = vrot.slane %v418_v26, %v430_v25  ;;  %v427_v32 = vrot.slane %v418_v26, %v426_v27  ;;  %v435_v33 = vrot.slane %v418_v26, %v434_v28  ;;  %v3051_v27 = vld [vmem:[%s5042_s3 + $0x8] sm:$0xff] }
 0x16d   :  { %v443_v42 = vrot.slane %v418_v26, %v442_v34  ;;  %v451_v49 = vrot.slane %v418_v26, %v450_v36  ;;  %v4929_v24 = vand.u32 127, %v420_v22 }
 0x16e   :  { %2775 = vmatpush1.bf16.msra.mxu0 %v3487_v37  ;;  %2904 = vmatpush1.bf16.msra.mxu1 %v3489_v38  ;;  %v4921_v20 = vld [vmem:[#allocation2 + $0x8] sm:$0xff] }
 0x16f   :  { %2776 = vmatprep.subr.bf16.mxu0 %v3496_v39  ;;  %2905 = vmatprep.subr.bf16.mxu1 %v3498_v40  ;;  %v439_v39 = vrot.slane %v418_v26, %v438_v31  ;;  %v4943_v28 = vadd.s32 128, %v4929_v24  ;;  %v4946_v22 = vadd.s32 256, %v4929_v24  ;;  %v4954_v31 = vadd.s32 512, %v4929_v24 }
 0x170   :  { %v4960_v34 = vadd.s32 640, %v4929_v24 }
 0x172   :  { %2777 = vmatpush1.bf16.msra.mxu0 %v3495_v45  ;;  %2906 = vmatpush1.bf16.msra.mxu1 %v3497_v46  ;;  %v447_v45 = vrot.slane %v418_v26, %v446_v35 }
 0x173   :  { %2778 = vmatprep.subr.bf16.mxu0 %v3504_v47  ;;  %2907 = vmatprep.subr.bf16.mxu1 %v3506_v48 }
 0x176   :  { %2779 = vmatpush1.bf16.msra.mxu0 %v3503_v53  ;;  %2908 = vmatpush1.bf16.msra.mxu1 %v3505_v54 }
 0x177   :  { %2780 = vmatprep.subr.bf16.mxu0 %v3512_v55  ;;  %2909 = vmatprep.subr.bf16.mxu1 %v3514_v56 }
 0x17a   :  { %2781 = vmatpush1.bf16.msra.mxu0 %v3511_v61  ;;  %2910 = vmatpush1.bf16.msra.mxu1 %v3513_v62 }
 0x17b   :  { %2782 = vmatprep.subr.bf16.mxu0 %v3520_v63  ;;  %2911 = vmatprep.subr.bf16.mxu1 %v3522_v0 }
 0x17e   :  { %2783 = vmatpush1.bf16.msra.mxu0 %v3519_v5  ;;  %2912 = vmatpush1.bf16.msra.mxu1 %v3521_v6 }
 0x17f   :  { %2784 = vmatprep.subr.bf16.mxu0 %v3528_v7  ;;  %2913 = vmatprep.subr.bf16.mxu1 %v3530_v8 }
 0x182   :  { %2785 = vmatpush1.bf16.msra.mxu0 %v3527_v9  ;;  %2914 = vmatpush1.bf16.msra.mxu1 %v3529_v10 }
 0x185   :  { %2787 = vmatmul.mubr.bf16.vlgmr.msra.gmra.mrb[4].mxu0 %v3638_v11  ;;  %2916 = vmatmul.mubr.bf16.vlgmr.msra.gmra.mrb[4].mxu1 %v3638_v11 }
 0x198   :  { %v2530_v12 = vpop.f32.mrb[0].mxu0  ;;  %v2659_v13 = vpop.f32.mrb[0].mxu1 }
 0x199   :  { %v2532_v14 = vpop.f32.mrb[1].mxu0  ;;  %v2661_v15 = vpop.f32.mrb[1].mxu1  ;;  %v4861_v37 = vadd.f32 %v2530_v12, %v423_v29  ;;  %v4863_v38 = vadd.f32 %v2659_v13, %v431_v30 }
 0x19a   :  { %v2534_v16 = vpop.f32.mrb[2].mxu0  ;;  %v2663_v17 = vpop.f32.mrb[2].mxu1  ;;  %v4865_v40 = vadd.f32 %v2532_v14, %v427_v32  ;;  %v4867_v41 = vadd.f32 %v2661_v15, %v435_v33  ;;  %v3050_v15 = vld [vmem:[%s5042_s3] sm:$0xff] }
 0x19b   :  { %v2536_v18 = vpop.f32.mrb[3].mxu0  ;;  %v2665_v19 = vpop.f32.mrb[3].mxu1  ;;  %v4869_v43 = vadd.f32 %v2534_v16, %v423_v29  ;;  %v4871_v44 = vadd.f32 %v2663_v17, %v431_v30  ;;  %v2928_v50 = vmax.f32 %v4861_v37, %v4863_v38  ;;  %v3641_v16 = vmov 0.0   ;;  %v4916_v17 = vld [vmem:[#allocation2] sm:$0xff] }
 0x19c   :  { %v4873_v46 = vadd.f32 %v2536_v18, %v427_v32  ;;  %v4875_v47 = vadd.f32 %v2665_v19, %v435_v33  ;;  %v2929_v54 = vmax.f32 %v4865_v40, %v4867_v41  ;;  %26 = vst.msk [vmem:[#allocation4] sm:$0xff] %vm21_vm0, %v3641_v16  ;;  %24 = vst.msk [vmem:[#allocation3] sm:$0xff] %vm21_vm0, %v3641_v16  ;;  %v4949_v30 = vadd.s32 384, %v4929_v24 }
 0x19d   :  { %v2937_v58 = vmax.f32 %v4869_v43, %v4871_v44  ;;  %25 = vst.msk [vmem:[#allocation3 + $0x8] sm:$0xff] %vm21_vm0, %v3641_v16  ;;  %27 = vst.msk [vmem:[#allocation4 + $0x8] sm:$0xff] %vm21_vm0, %v3641_v16 }
 0x19e   :  { %v2938_v0 = vmax.f32 %v4873_v46, %v4875_v47 }
 0x258   :  { %v2788_v48 = vpop.f32.mrb[4].mxu0  ;;  %v2917_v52 = vpop.f32.mrb[4].mxu1 }
 0x259   :  { %v4879_v51 = vadd.f32 %v2788_v48, %v439_v39  ;;  %v2790_v53 = vpop.f32.mrb[5].mxu0  ;;  %v2919_v56 = vpop.f32.mrb[5].mxu1  ;;  %v4887_v59 = vadd.f32 %v2917_v52, %v447_v45  ;;  %v4970_v48 = vadd.s32 896, %v4929_v24 }
 0x25a   :  { %v4883_v55 = vadd.f32 %v2790_v53, %v443_v42  ;;  %v2792_v57 = vpop.f32.mrb[6].mxu0  ;;  %v2921_v61 = vpop.f32.mrb[6].mxu1  ;;  %v4894_v1 = vadd.f32 %v2919_v56, %v451_v49 }
 0x25b   :  { %v4889_v60 = vadd.f32 %v2792_v57, %v439_v39  ;;  %v2794_v62 = vpop.f32.mrb[7].mxu0  ;;  %v2930_v63 = vmax.f32 %v2928_v50, %v4879_v51  ;;  %v2923_v3 = vpop.f32.mrb[7].mxu1  ;;  %v4901_v7 = vadd.f32 %v2921_v61, %v447_v45  ;;  %v4965_v39 = vadd.s32 768, %v4929_v24 }
 0x25c   :  { %v4896_v2 = vadd.f32 %v2794_v62, %v443_v42  ;;  %v2931_v4 = vmax.f32 %v2929_v54, %v4883_v55  ;;  %v4904_v9 = vadd.f32 %v2923_v3, %v451_v49 }
 0x25d   :  { %v2939_v5 = vmax.f32 %v2937_v58, %v4889_v60  ;;  %v2932_v6 = vmax.f32 %v2930_v63, %v4887_v59 }
 0x25e   :  { %v2940_v8 = vmax.f32 %v2938_v0, %v4896_v2  ;;  %v2933_v10 = vmax.f32 %v2931_v4, %v4894_v1 }
 0x25f   :  { %v2941_v12 = vmax.f32 %v2939_v5, %v4901_v7 }
 0x260   :  { %v2934_v11 = vmax.f32 %v2932_v6, %v2933_v10  ;;  %v2942_v13 = vmax.f32 %v2940_v8, %v4904_v9 }
 0x262   :  { %2935 = vmax.xlane.f32.xlu0 %v2934_v11  ;;  %v2943_v14 = vmax.f32 %v2941_v12, %v2942_v13 }
 0x266   :  { %2944 = vmax.xlane.f32.xlu0 %v2943_v14 }
 0x27c   :  { %3059 = vperm.xlu0 %3583, %v3050_v15  }
 0x2ef   :  { %v2936_v18 = vpop.xlane.xlu0 %2935 }
 0x2f0   :  { %v4919_v19 = vmax.f32 %v4916_v17, %v2936_v18 }
 0x2f2   :  { %v2948_v21 = vsub.f32 %v4916_v17, %v4919_v19  ;;  %3039 = vst.msk [vmem:[#allocation2] sm:$0xff] %vm21_vm0, %v4919_v19  ;;  %2960 = vperm.xlu1 %3582, %v4919_v19   ;;  %v3057_v17 = vld [vmem:[#allocation4 + $0x8] sm:$0xff] }
 0x2f3   :  { %v2945_v23 = vpop.xlane.xlu0 %2944 }
 0x2f4   :  { %v4932_v25 = vmax.f32 %v4921_v20, %v2945_v23 }
 0x2f6   :  { %v2949_v26 = vsub.f32 %v4921_v20, %v4932_v25  ;;  %3040 = vst.msk [vmem:[#allocation2 + $0x8] sm:$0xff] %vm21_vm0, %v4932_v25  ;;  %2965 = vperm.xlu1 %3582, %v4932_v25  }
 0x2fa   :  { %3062 = vperm.xlu1 %3582, %v3051_v27  }
 0x2fb   :  { %v3060_v29 = vpop.permute.xlu0 %3059 }
 0x2fc   :  { %vm3064_vm1 = vcmp.eq.s32.totalorder %v4929_v24, %v3060_v29  ;;  %vm3065_vm2 = vcmp.eq.s32.totalorder %v4943_v28, %v3060_v29  ;;  %vm3066_vm3 = vcmp.eq.s32.totalorder %v4946_v22, %v3060_v29  ;;  %vm3067_vm4 = vcmp.eq.s32.totalorder %v4949_v30, %v3060_v29 }
 0x2fd   :  { %v3080_v32 = vsel %vm3064_vm1, %v4861_v37, 0.0  ;;  %v3081_v33 = vsel %vm3065_vm2, %v4865_v40, 0.0  ;;  %v3082_v36 = vsel %vm3066_vm3, %v4863_v38, 0.0  ;;  %vm3068_vm5 = vcmp.eq.s32.totalorder %v4954_v31, %v3060_v29 }
 0x2fe   :  { %v3096_v35 = vadd.f32 %v3081_v33, %v3080_v32  ;;  %v3083_v45 = vsel %vm3067_vm4, %v4867_v41, 0.0  ;;  %vm3069_vm6 = vcmp.eq.s32.totalorder %v4960_v34, %v3060_v29  ;;  %v3084_v50 = vsel %vm3068_vm5, %v4879_v51, 0.0 }
 0x2ff   :  { %vm3070_vm7 = vcmp.eq.s32.totalorder %v4965_v39, %v3060_v29  ;;  %v3085_v53 = vsel %vm3069_vm6, %v4883_v55, 0.0  ;;  %vm3071_vm8 = vcmp.eq.s32.totalorder %v4970_v48, %v3060_v29 }
 0x300   :  { %v3097_v42 = vadd.f32 %v3096_v35, %v3082_v36  ;;  %v3086_v56 = vsel %vm3070_vm7, %v4887_v59, 0.0  ;;  %v3087_v58 = vsel %vm3071_vm8, %v4894_v1, 0.0 }
 0x302   :  { %v3098_v49 = vadd.f32 %v3097_v42, %v3083_v45 }
 0x304   :  { %v3099_v52 = vadd.f32 %v3098_v49, %v3084_v50 }
 0x306   :  { %v3100_v54 = vadd.f32 %v3099_v52, %v3085_v53 }
 0x308   :  { %v3101_v57 = vadd.f32 %v3100_v54, %v3086_v56 }
 0x30a   :  { %v3102_v61 = vadd.f32 %v3101_v57, %v3087_v58 }
 0x30c   :  { %3103 = vadd.xlane.f32.xlu0 %v3102_v61 }
 0x371   :  { %v2961_v62 = vpop.permute.xlu1 %2960 }
 0x372   :  { %v2968_v63 = vsub.f32 %v4861_v37, %v2961_v62  ;;  %v2969_v0 = vsub.f32 %v4865_v40, %v2961_v62  ;;  %v2970_v3 = vsub.f32 %v4863_v38, %v2961_v62  ;;  %v2971_v4 = vsub.f32 %v4867_v41, %v2961_v62 }
 0x373   :  { %v2972_v12 = vsub.f32 %v4879_v51, %v2961_v62  ;;  %v2973_v40 = vsub.f32 %v4883_v55, %v2961_v62  ;;  %v2974_v38 = vsub.f32 %v4887_v59, %v2961_v62  ;;  %v2975_v27 = vsub.f32 %v4894_v1, %v2961_v62 }
 0x374   :  { %v2984_v5 = vmul.f32 1.442695, %v2968_v63  ;;  %v2986_v6 = vmul.f32 1.442695, %v2969_v0  ;;  %v2988_v8 = vmul.f32 1.442695, %v2970_v3 }
 0x375   :  { %v2990_v10 = vmul.f32 1.442695, %v2971_v4  ;;  %v2966_v11 = vpop.permute.xlu1 %2965  ;;  %v2992_v51 = vmul.f32 1.442695, %v2972_v12  ;;  %v2994_v29 = vmul.f32 1.442695, %v2973_v40 }
 0x376   :  { %3593 = vpow2.f32 %v2984_v5  ;;  %v2976_v13 = vsub.f32 %v4869_v43, %v2966_v11  ;;  %v2977_v14 = vsub.f32 %v4873_v46, %v2966_v11  ;;  %v2978_v37 = vsub.f32 %v4871_v44, %v2966_v11 }
 0x377   :  { %3595 = vpow2.f32 %v2986_v6  ;;  %v2979_v18 = vsub.f32 %v4875_v47, %v2966_v11  ;;  %v2980_v32 = vsub.f32 %v4889_v60, %v2966_v11  ;;  %v2996_v55 = vmul.f32 1.442695, %v2974_v38 }
 0x378   :  { %3597 = vpow2.f32 %v2988_v8  ;;  %v3000_v41 = vmul.f32 1.442695, %v2976_v13  ;;  %v3002_v15 = vmul.f32 1.442695, %v2977_v14  ;;  %v3004_v16 = vmul.f32 1.442695, %v2978_v37 }
 0x379   :  { %v4990_v23 = vpop.permute.xlu1 %3062  ;;  %3599 = vpow2.f32 %v2990_v10  ;;  %v3006_v59 = vmul.f32 1.442695, %v2979_v18  ;;  %v2981_v33 = vsub.f32 %v4896_v2, %v2966_v11  ;;  %v2998_v35 = vmul.f32 1.442695, %v2975_v27 }
 0x37a   :  { %3601 = vpow2.f32 %v3000_v41  ;;  %vm3072_vm9 = vcmp.eq.s32.totalorder %v4929_v24, %v4990_v23  ;;  %vm3073_vm10 = vcmp.eq.s32.totalorder %v4943_v28, %v4990_v23  ;;  %v2982_v1 = vsub.f32 %v4901_v7, %v2966_v11 }
 0x37b   :  { %3603 = vpow2.f32 %v3002_v15  ;;  %v3088_v36 = vsel %vm3072_vm9, %v4869_v43, 0.0  ;;  %v3008_v42 = vmul.f32 1.442695, %v2980_v32  ;;  %v3089_v45 = vsel %vm3073_vm10, %v4873_v46, 0.0 }
 0x37c   :  { %3605 = vpow2.f32 %v3004_v16  ;;  %vm3074_vm11 = vcmp.eq.s32.totalorder %v4946_v22, %v4990_v23  ;;  %v2983_v28 = vsub.f32 %v4904_v9, %v2966_v11  ;;  %v3010_v50 = vmul.f32 1.442695, %v2981_v33  ;;  %v3056_v33 = vld [vmem:[#allocation4] sm:$0xff] }
 0x37d   :  { %3607 = vpow2.f32 %v2992_v51  ;;  %v3105_v52 = vadd.f32 %v3089_v45, %v3088_v36  ;;  %v3012_v56 = vmul.f32 1.442695, %v2982_v1  ;;  %v3090_v57 = vsel %vm3074_vm11, %v4871_v44, 0.0 }
 0x37e   :  { %3609 = vpow2.f32 %v2994_v29  ;;  %vm3075_vm12 = vcmp.eq.s32.totalorder %v4949_v30, %v4990_v23  ;;  %v3014_v62 = vmul.f32 1.442695, %v2983_v28  ;;  %vm3076_vm13 = vcmp.eq.s32.totalorder %v4954_v31, %v4990_v23 }
 0x37f   :  { %3611 = vpow2.f32 %v2996_v55  ;;  %v3106_v22 = vadd.f32 %v3105_v52, %v3090_v57  ;;  %v3091_v5 = vsel %vm3075_vm12, %v4875_v47, 0.0  ;;  %v3092_v13 = vsel %vm3076_vm13, %v4889_v60, 0.0 }
 0x380   :  { %v3594_v49 = vpop.eup %3593  ;;  %3613 = vpow2.f32 %v3006_v59  ;;  %vm3077_vm14 = vcmp.eq.s32.totalorder %v4960_v34, %v4990_v23  ;;  %vm3078_vm15 = vcmp.eq.s32.totalorder %v4965_v39, %v4990_v23  ;;  %vm3079_vm1 = vcmp.eq.s32.totalorder %v4970_v48, %v4990_v23  ;;  %v2954_v23 = vld [vmem:[#allocation3] sm:$0xff] }
 0x381   :  { %v3596_v24 = vpop.eup %3595  ;;  %3615 = vpow2.f32 %v2998_v35  ;;  %v3107_v44 = vadd.f32 %v3106_v22, %v3091_v5  ;;  %v3093_v31 = vsel %vm3077_vm14, %v4896_v2, 0.0  ;;  %v3094_v32 = vsel %vm3078_vm15, %v4901_v7, 0.0 }
 0x382   :  { %v3598_v53 = vpop.eup %3597  ;;  %v3016_v43 = vadd.f32 %v3596_v24, %v3594_v49  ;;  %3617 = vpow2.f32 %v3008_v42  ;;  %v3095_v59 = vsel %vm3079_vm1, %v4904_v9, 0.0  ;;  %v2950_v39 = vmul.f32 1.442695, %v2948_v21  ;;  %v2955_v49 = vld [vmem:[#allocation3 + $0x8] sm:$0xff] }
 0x383   :  { %v3600_v54 = vpop.eup %3599  ;;  %3619 = vpow2.f32 %v3010_v50  ;;  %v3108_v47 = vadd.f32 %v3107_v44, %v3092_v13  ;;  %v2952_v7 = vmul.f32 1.442695, %v2949_v26 }
 0x384   :  { %v3602_v46 = vpop.eup %3601  ;;  %v3017_v58 = vadd.f32 %v3598_v53, %v3016_v43  ;;  %3621 = vpow2.f32 %v3012_v56  ;;  %v3121_v53 = vld [vmem:[#allocation2] sm:$0xff] }
 0x385   :  { %v3604_v61 = vpop.eup %3603  ;;  %3623 = vpow2.f32 %v3014_v62  ;;  %v3109_v51 = vadd.f32 %v3108_v47, %v3093_v31 }
 0x386   :  { %v3606_v63 = vpop.eup %3605  ;;  %v3018_v0 = vadd.f32 %v3600_v54, %v3017_v58  ;;  %v3025_v3 = vadd.f32 %v3604_v61, %v3602_v46  ;;  %3625 = vpow2.f32 %v2950_v39  ;;  %v3122_v58 = vld [vmem:[#allocation2 + $0x8] sm:$0xff] }
 0x387   :  { %v3608_v4 = vpop.eup %3607  ;;  %v3110_v34 = vadd.f32 %v3109_v51, %v3094_v32  ;;  %3627 = vpow2.f32 %v2952_v7 }
 0x388   :  { %v3019_v6 = vadd.f32 %v3608_v4, %v3018_v0  ;;  %v3026_v8 = vadd.f32 %v3606_v63, %v3025_v3  ;;  %v3610_v10 = vpop.eup %3609 }
 0x389   :  { %v3612_v30 = vpop.eup %3611  ;;  %v3111_v2 = vadd.f32 %v3110_v34, %v3095_v59 }
 0x38a   :  { %v3020_v11 = vadd.f32 %v3610_v10, %v3019_v6  ;;  %v3614_v12 = vpop.eup %3613 }
 0x38b   :  { %v3616_v14 = vpop.eup %3615  ;;  %v3027_v40 = vadd.f32 %v3614_v12, %v3026_v8 }
 0x38c   :  { %v3021_v37 = vadd.f32 %v3612_v30, %v3020_v11  ;;  %v3618_v38 = vpop.eup %3617 }
 0x38d   :  { %v3028_v15 = vadd.f32 %v3618_v38, %v3027_v40  ;;  %v3620_v16 = vpop.eup %3619 }
 0x38e   :  { %v3022_v41 = vadd.f32 %v3616_v14, %v3021_v37  ;;  %v3622_v60 = vpop.eup %3621 }
 0x38f   :  { %v3029_v18 = vadd.f32 %v3620_v16, %v3028_v15  ;;  %v3624_v29 = vpop.eup %3623 }
 0x390   :  { %3023 = vadd.xlane.f32.xlu1 %v3022_v41  ;;  %v3626_v48 = vpop.eup %3625 }
 0x391   :  { %v3030_v27 = vadd.f32 %v3622_v60, %v3029_v18  ;;  %v2956_v9 = vmul.f32 %v3626_v48, %v2954_v23  ;;  %v3628_v45 = vpop.eup %3627 }
 0x392   :  { %v2957_v24 = vmul.f32 %v3628_v45, %v2955_v49 }
 0x393   :  { %v3031_v55 = vadd.f32 %v3624_v29, %v3030_v27 }
 0x395   :  { %3032 = vadd.xlane.f32.xlu1 %v3031_v55 }
 0x399   :  { %3112 = vadd.xlane.f32.xlu1 %v3111_v2  ;;  %v3104_v35 = vpop.xlane.xlu0 %3103 }
 0x39a   :  { %v3114_v36 = vadd.f32 %v3104_v35, %v3056_v33 }
 0x39c   :  { %3116 = vst.msk [vmem:[#allocation4] sm:$0xff] %vm21_vm0, %v3114_v36 }
 0x3a3   :  { %v3131_v54 = vld [vmem:[#allocation4] sm:$0xff] }
 0x41d   :  { %v3024_v1 = vpop.xlane.xlu1 %3023 }
 0x41e   :  { %v3034_v42 = vadd.f32 %v3024_v1, %v2956_v9 }
 0x420   :  { %3037 = vst.msk [vmem:[#allocation3] sm:$0xff] %vm21_vm0, %v3034_v42 }
 0x422   :  { %v3033_v28 = vpop.xlane.xlu1 %3032 }
 0x423   :  { %v3035_v50 = vadd.f32 %v3033_v28, %v2957_v24 }
 0x425   :  { %3038 = vst.msk [vmem:[#allocation3 + $0x8] sm:$0xff] %vm21_vm0, %v3035_v50 }
 0x426   :  { %v3113_v21 = vpop.xlane.xlu1 %3112 }
 0x427   :  { %v3123_v19 = vld [vmem:[#allocation3] sm:$0xff]  ;;  %v3115_v20 = vadd.f32 %v3113_v21, %v3057_v17 }
 0x428   :  { %3629 = vlog2.f32 %v3123_v19 }
 0x429   :  { %3117 = vst.msk [vmem:[#allocation4 + $0x8] sm:$0xff] %vm21_vm0, %v3115_v20 }
 0x42c   :  { %v3124_v25 = vld [vmem:[#allocation3 + $0x8] sm:$0xff] }
 0x42d   :  { %3631 = vlog2.f32 %v3124_v25 }
 0x430   :  { %v3132_v61 = vld [vmem:[#allocation4 + $0x8] sm:$0xff] }
 0x432   :  { %v3630_v26 = vpop.eup %3629 }
 0x433   :  { %v3126_v52 = vmul.f32 0.6931472, %v3630_v26 }
 0x435   :  { %v3129_v43 = vadd.f32 %v3126_v52, %v3121_v53 }
 0x437   :  { %v3133_v56 = vsub.f32 %v3129_v43, %v3131_v54  ;;  %v3632_v57 = vpop.eup %3631 }
 0x438   :  { %v3128_v46 = vmul.f32 0.6931472, %v3632_v57 }
 0x439   :  { %3135 = vst.msk [vmem:[%s5043_s4] sm:$0xff] %vm21_vm0, %v3133_v56 }
 0x43a   :  { %v3130_v22 = vadd.f32 %v3128_v46, %v3122_v58 }
 0x43c   :  { %v3134_v62 = vsub.f32 %v3130_v22, %v3132_v61 }
 0x43e   :  { %3136 = vst.msk [vmem:[%s5043_s4 + $0x8] sm:$0xff] %vm21_vm0, %v3134_v62 }

</bundles_post_ra>
